<compile_context>
chip_gen: v5e
topology: v5e:2x2
jax: 0.10.0
libtpu: 0.0.40
codegen_flags: <defaults>
</compile_context>

<pallas_src>
import functools

import jax
import jax.numpy as jnp
from jax import lax
from jax.experimental import pallas as pl
from jax.experimental.pallas import tpu as pltpu


def _round_up(x, m):
    return ((x + m - 1) // m) * m


def _pick_tq(hw):
    # Output block last dim must be a multiple of 128 or the full HW extent.
    # Cap at 256: larger q-tiles only grow softmax temporaries / first-writeback
    # latency without improving MXU utilization.
    if hw % 128 != 0:
        return hw
    return 256 if hw % 256 == 0 else 128


def _pick_tkv(hw):
    # KV chunk for the online softmax; single pass for small feature maps.
    if hw % 128 != 0 or hw <= 1024:
        return hw
    for cand in (1024, 512, 256, 128):
        if hw % cand == 0:
            return cand
    return hw


def _vmem_limit_bytes():
    # Size the scoped-VMEM limit from the actual chip (128 MiB on v5e/v6e,
    # 64 MiB per TensorCore on v7x) with 25% headroom, instead of hard-coding.
    try:
        cap = int(pltpu.get_tpu_info().vmem_capacity_bytes)
    except Exception:
        cap = 64 * 1024 * 1024
    return int(cap * 3 // 4)


def _self_attention_kernel(c8p, tq, tkv, mm_dtype,
                           x_hbm, w_ref, b_ref, gamma_ref,
                           o_ref,
                           x_s, q_s, k_s, v_s, dma_sem):
    """Grid = (B, HW // tq).

    x_hbm     : (B, C, HW) raw HBM ref (memory_space=pl.ANY), DMA'd manually
    w_ref     : (2*c8p + C, C)   fused [Wq; Wk; Wv] (Q/K rows zero-padded to c8p)
    b_ref     : (2*c8p + C, 1)   fused biases (f32)
    gamma_ref : (1,) in SMEM
    o_ref     : (1, C, tq)       output tile (channel-major, lane dim = tq)
    x_s       : (C, HW)          scratch: x slab of current batch (single-buffered)
    q_s       : (c8p, HW)        scratch: Q, lane-dense (same layout as K)
    k_s       : (c8p, HW)        scratch: K
    v_s       : (C,   HW)        scratch: V
    dma_sem   : DMA semaphore for the x copy
    """
    b = pl.program_id(0)
    qi = pl.program_id(1)
    hw = k_s.shape[1]
    C = v_s.shape[0]

    # Per-batch setup: DMA x once, project Q/K/V once (first q-tile only).
    @pl.when(qi == 0)
    def _():
        cp = pltpu.make_async_copy(x_hbm.at[b], x_s, dma_sem)
        cp.start()
        cp.wait()
        xb = x_s[...].astype(mm_dtype)                                   # (C, HW)
        # Three separate projections straight into scratch (no fused QKV temp).
        q_s[...] = (jnp.dot(w_ref[:c8p, :], xb,
                            preferred_element_type=jnp.float32)
                    + b_ref[:c8p, :]).astype(q_s.dtype)                  # (c8p, HW)
        k_s[...] = (jnp.dot(w_ref[c8p:2 * c8p, :], xb,
                            preferred_element_type=jnp.float32)
                    + b_ref[c8p:2 * c8p, :]).astype(k_s.dtype)           # (c8p, HW)
        v_s[...] = (jnp.dot(w_ref[2 * c8p:, :], xb,
                            preferred_element_type=jnp.float32)
                    + b_ref[2 * c8p:, :]).astype(v_s.dtype)              # (C, HW)

    qs = pl.multiple_of(qi * tq, tq)
    q_t = q_s[:, pl.ds(qs, tq)]            # (c8p, tq)  lane-dense, aligned slice
    x_tile = x_s[:, pl.ds(qs, tq)]         # (C, tq)    residual (exact f32)

    if tkv >= hw:
        # Single-pass softmax over the full key axis.
        logits = lax.dot_general(q_t, k_s[...],
                                 dimension_numbers=(((0,), (0,)), ((), ())),
                                 preferred_element_type=jnp.float32)     # (tq, HW)
        logits = logits - jnp.max(logits, axis=-1, keepdims=True)
        p = jnp.exp(logits)                                              # (tq, HW) f32
        l = jnp.sum(p, axis=-1, keepdims=True)                           # (tq, 1)
        # Contract the lane dims of V and P directly (transposed-RHS MXU matmul;
        # no materialized P^T).
        acc = lax.dot_general(v_s[...], p.astype(mm_dtype),
                              dimension_numbers=(((1,), (1,)), ((), ())),
                              preferred_element_type=jnp.float32)        # (C, tq)
    else:
        # Online softmax over KV chunks: live temporaries are (tq, tkv).
        nkv = hw // tkv

        def body(j, carry):
            m, l_c, acc_c = carry
            ks = pl.multiple_of(j * tkv, tkv)
            k_c = k_s[:, pl.ds(ks, tkv)]                                 # (c8p, tkv)
            v_c = v_s[:, pl.ds(ks, tkv)]                                 # (C, tkv)
            s = lax.dot_general(q_t, k_c,
                                dimension_numbers=(((0,), (0,)), ((), ())),
                                preferred_element_type=jnp.float32)      # (tq, tkv)
            m_new = jnp.maximum(m, jnp.max(s, axis=-1, keepdims=True))
            alpha = jnp.exp(m - m_new)                                   # (tq, 1)
            p = jnp.exp(s - m_new)                                       # (tq, tkv)
            l_new = alpha * l_c + jnp.sum(p, axis=-1, keepdims=True)
            pv = lax.dot_general(v_c, p.astype(mm_dtype),
                                 dimension_numbers=(((1,), (1,)), ((), ())),
                                 preferred_element_type=jnp.float32)     # (C, tq)
            acc_new = acc_c * jnp.transpose(alpha) + pv
            return m_new, l_new, acc_new

        m0 = jnp.full((tq, 1), -jnp.inf, dtype=jnp.float32)
        l0 = jnp.zeros((tq, 1), dtype=jnp.float32)
        a0 = jnp.zeros((C, tq), dtype=jnp.float32)
        _, l, acc = lax.fori_loop(0, nkv, body, (m0, l0, a0))

    # Fold softmax normalization into the small (C, tq) output.
    inv = pl.reciprocal(l, approx=False)                                 # (tq, 1)
    out_ct = acc * jnp.transpose(inv)                                    # (C, tq)

    gamma = gamma_ref[0]
    o_ref[0] = (gamma * out_ct + x_tile.astype(jnp.float32)).astype(o_ref.dtype)


def self_attention_pallas(x_nchw, wq, bq, wk, bk, wv, bv, gamma,
                          *, tq=None, tkv=None, matmul_dtype=jnp.bfloat16):
    """x_nchw: (B, C, H, W); conv weights in PyTorch layout (O, C_in, 1, 1).

    matmul_dtype=bf16 (default) is the perf path: bf16 MXU operands, f32
    accumulation and f32 softmax.  Pass jnp.float32 for validation.
    """
    B, C, H, W = x_nchw.shape
    HW = H * W
    C8 = wq.shape[0]
    mm_dtype = jnp.dtype(matmul_dtype)
    # Pad Q/K channel dim to the sublane tile of the matmul dtype (bf16: 16, f32: 8).
    sub = 16 if mm_dtype.itemsize == 2 else 8
    C8p = max(sub, _round_up(C8, sub))

    if tq is None:
        tq = _pick_tq(HW)
    if tkv is None:
        tkv = _pick_tkv(HW)
    assert HW % tq == 0 and (tq == HW or tq % 128 == 0), (HW, tq)
    assert HW % tkv == 0 and (tkv == HW or tkv % 128 == 0), (HW, tkv)

    # NCHW -> (B, C, HW): pure reshape, no HBM transpose round trip.
    x_chw = x_nchw.reshape(B, C, HW)

    # Fused 1x1-conv weight applied as W_all @ x (rows: Wq | Wk | Wv);
    # zero-padded rows/biases contribute exactly 0 to the logits.
    def pad_rows(w2d):
        return jnp.pad(w2d, ((0, C8p - w2d.shape[0]), (0, 0)))

    w_all = jnp.concatenate(
        [pad_rows(wq.reshape(C8, C)), pad_rows(wk.reshape(C8, C)), wv.reshape(C, C)],
        axis=0).astype(mm_dtype)                                        # (2*C8p + C, C)
    b_all = jnp.concatenate(
        [jnp.pad(bq, (0, C8p - C8)), jnp.pad(bk, (0, C8p - C8)), bv]
    ).reshape(-1, 1).astype(jnp.float32)                                # (2*C8p + C, 1)
    rows = 2 * C8p + C

    gamma_arr = jnp.reshape(jnp.asarray(gamma, jnp.float32), (1,))

    kernel = functools.partial(_self_attention_kernel, C8p, tq, tkv, mm_dtype)

    out_chw = pl.pallas_call(
        kernel,
        out_shape=jax.ShapeDtypeStruct((B, C, HW), x_chw.dtype),
        grid=(B, HW // tq),
        in_specs=[
            pl.BlockSpec(memory_space=pl.ANY),                  # x: raw HBM, manual DMA
            pl.BlockSpec((rows, C), lambda b, q: (0, 0)),       # fused [Wq; Wk; Wv]
            pl.BlockSpec((rows, 1), lambda b, q: (0, 0)),       # fused biases
            pl.BlockSpec(memory_space=pltpu.MemorySpace.SMEM),  # gamma scalar
        ],
        out_specs=pl.BlockSpec((1, C, tq), lambda b, q: (b, 0, q)),
        scratch_shapes=[
            pltpu.VMEM((C, HW), x_chw.dtype),   # x slab (single-buffered by hand)
            pltpu.VMEM((C8p, HW), mm_dtype),    # Q (lane-dense, same layout as K)
            pltpu.VMEM((C8p, HW), mm_dtype),    # K
            pltpu.VMEM((C, HW), mm_dtype),      # V
            pltpu.SemaphoreType.DMA(()),        # x-copy semaphore
        ],
        compiler_params=pltpu.CompilerParams(
            # Batch axis parallel (megacore); q-tile axis must stay "arbitrary"
            # because Q/K/V scratch carries state across q-tiles of a batch.
            dimension_semantics=("parallel", "arbitrary"),
            vmem_limit_bytes=_vmem_limit_bytes()),
    )(x_chw, w_all, b_all, gamma_arr)

    return out_chw.reshape(B, C, H, W)


def self_attention_ref(x, wq, bq, wk, bk, wv, bv, gamma):
    """Pure-JAX reference that mirrors the PyTorch forward exactly (NCHW)."""
    B, C, H, W = x.shape
    HW = H * W

    def conv1x1(x, w, b):
        O = w.shape[0]
        return jnp.einsum('bchw,oc->bohw', x, w.reshape(O, C)) + b.reshape(1, O, 1, 1)

    q = conv1x1(x, wq, bq).reshape(B, -1, HW).transpose(0, 2, 1)   # (B, HW, C8)
    k = conv1x1(x, wk, bk).reshape(B, -1, HW)                      # (B, C8, HW)
    attn = jax.nn.softmax(jnp.einsum('bqc,bck->bqk', q, k), axis=-1)
    v = conv1x1(x, wv, bv).reshape(B, -1, HW)                      # (B, C, HW)
    out = jnp.einsum('bcj,bij->bci', v, attn)                      # V @ attn^T
    return gamma * out.reshape(B, C, H, W) + x


if __name__ == "__main__":
    B, C, H, W = 2, 16, 16, 16        # C >= 8 so C // 8 >= 1; HW = 256
    C8 = C // 8

    key = jax.random.PRNGKey(0)
    kx, kq, kbq, kk, kbk, kv, kbv = jax.random.split(key, 7)

    x = jax.random.normal(kx, (B, C, H, W), dtype=jnp.float32)

    # Deterministic parameter init (PyTorch Conv2d weight layout: (O, C, 1, 1)).
    wq = 0.1 * jax.random.normal(kq,  (C8, C, 1, 1), dtype=jnp.float32)
    bq = 0.1 * jax.random.normal(kbq, (C8,),         dtype=jnp.float32)
    wk = 0.1 * jax.random.normal(kk,  (C8, C, 1, 1), dtype=jnp.float32)
    bk = 0.1 * jax.random.normal(kbk, (C8,),         dtype=jnp.float32)
    wv = 0.1 * jax.random.normal(kv,  (C,  C, 1, 1), dtype=jnp.float32)
    bv = 0.1 * jax.random.normal(kbv, (C,),          dtype=jnp.float32)
    # Module __init__ sets gamma = 0 (output == x); nonzero exercises attention path.
    gamma = jnp.float32(0.5)

    ref = self_attention_ref(x, wq, bq, wk, bk, wv, bv, gamma)

    # f32 validation path, single-pass softmax (tq = tkv = HW).
    out = jax.block_until_ready(
        self_attention_pallas(x, wq, bq, wk, bk, wv, bv, gamma,
                              matmul_dtype=jnp.float32))
    assert out.shape == (B, C, H, W)
    assert jnp.allclose(out, ref, atol=2e-5, rtol=2e-5), \
        f"f32 single-pass max abs err = {jnp.max(jnp.abs(out - ref))}"

    # f32 validation path, multiple q-tiles + chunked online softmax.
    out_chunk = jax.block_until_ready(
        self_attention_pallas(x, wq, bq, wk, bk, wv, bv, gamma,
                              tq=128, tkv=128, matmul_dtype=jnp.float32))
    assert jnp.allclose(out_chunk, ref, atol=2e-5, rtol=2e-5), \
        f"f32 chunked max abs err = {jnp.max(jnp.abs(out_chunk - ref))}"

    # Default perf path: bf16 MXU operands, f32 accumulation + f32 softmax.
    out_bf16 = jax.block_until_ready(
        self_attention_pallas(x, wq, bq, wk, bk, wv, bv, gamma))
    assert jnp.allclose(out_bf16, ref, atol=5e-2, rtol=5e-2), \
        f"bf16 max abs err = {jnp.max(jnp.abs(out_bf16 - ref))}"

    print("KERNEL_OK")
</pallas_src>

<mosaic_0001>
module attributes {stable_mosaic.version = 11 : i64} {
  func.func @_self_attention_kernel(%arg0: i32, %arg1: i32, %arg2: memref<2x16x256xf32, #tpu.memory_space<any>>, %arg3: memref<32x16xf32, #tpu.memory_space<vmem>>, %arg4: memref<32x1xf32, #tpu.memory_space<vmem>>, %arg5: memref<1xf32, #tpu.memory_space<smem>>, %arg6: memref<1x16x256xf32, #tpu.memory_space<vmem>>, %arg7: memref<16x256xf32, #tpu.memory_space<vmem>>, %arg8: memref<8x256xf32, #tpu.memory_space<vmem>>, %arg9: memref<8x256xf32, #tpu.memory_space<vmem>>, %arg10: memref<16x256xf32, #tpu.memory_space<vmem>>, %arg11: memref<!tpu.dma_semaphore, #tpu.memory_space<semaphore_mem>>) attributes {dimension_semantics = [#tpu.dimension_semantics<parallel>, #tpu.dimension_semantics<arbitrary>], iteration_bounds = array<i64: 2, 1>, scalar_prefetch = 0 : i64, scratch_operands = 5 : i64, tpu.core_type = #tpu.core_type<tc>, window_params = [{}, {pipeline_mode = #tpu.pipeline_mode<synchronous>, transform_indices = @transform_1, window_bounds = array<i64: 32, 16>}, {pipeline_mode = #tpu.pipeline_mode<synchronous>, transform_indices = @transform_2, window_bounds = array<i64: 32, 1>}, {transform_indices = @transform_3, window_bounds = array<i64: 1>}, {transform_indices = @transform_4, window_bounds = array<i64: 1, 16, 256>}]} {
    %c0_i32 = arith.constant 0 : i32
    %0 = arith.cmpi eq, %arg1, %c0_i32 : i32
    %1 = arith.extui %0 : i1 to i32
    %c0_i32_0 = arith.constant 0 : i32
    %2 = arith.cmpi ne, %1, %c0_i32_0 : i32
    scf.if %2 {
      %c0_i32_13 = arith.constant 0 : i32
      %c0_i32_14 = arith.constant 0 : i32
      %31 = tpu.memref_slice %arg2[%arg0, %c0_i32_13, %c0_i32_14] : memref<2x16x256xf32, #tpu.memory_space<any>> -> memref<1x16x256xf32, #tpu.memory_space<any>>
      %32 = tpu.memref_squeeze %31 : memref<1x16x256xf32, #tpu.memory_space<any>> -> memref<16x256xf32, #tpu.memory_space<any>>
      tpu.enqueue_dma source(%32 : memref<16x256xf32, #tpu.memory_space<any>>) target(%arg7 : memref<16x256xf32, #tpu.memory_space<vmem>>) target_semaphore(%arg11 : memref<!tpu.dma_semaphore, #tpu.memory_space<semaphore_mem>>)
      %c0_i32_15 = arith.constant 0 : i32
      %c0_i32_16 = arith.constant 0 : i32
      %33 = tpu.memref_slice %arg2[%arg0, %c0_i32_15, %c0_i32_16] : memref<2x16x256xf32, #tpu.memory_space<any>> -> memref<1x16x256xf32, #tpu.memory_space<any>>
      %34 = tpu.memref_squeeze %33 : memref<1x16x256xf32, #tpu.memory_space<any>> -> memref<16x256xf32, #tpu.memory_space<any>>
      tpu.wait_dma2 semaphore(%arg11 : memref<!tpu.dma_semaphore, #tpu.memory_space<semaphore_mem>>) src(%34 : memref<16x256xf32, #tpu.memory_space<any>>) dst(%arg7 : memref<16x256xf32, #tpu.memory_space<vmem>>)
      %c0_17 = arith.constant 0 : index
      %c0_18 = arith.constant 0 : index
      %35 = vector.load %arg7[%c0_17, %c0_18] : memref<16x256xf32, #tpu.memory_space<vmem>>, vector<16x256xf32>
      %c0_19 = arith.constant 0 : index
      %c0_20 = arith.constant 0 : index
      %36 = vector.load %arg3[%c0_19, %c0_20] : memref<32x16xf32, #tpu.memory_space<vmem>>, vector<8x16xf32>
      %cst_21 = arith.constant dense<0.000000e+00> : vector<8x256xf32>
      %37 = tpu.matmul %36, %35, %cst_21 {dimension_numbers = #tpu.dot_dimension_numbers<[1], [0], [0], [1], [0, 0, 1, 1], [], []>} : vector<8x16xf32>, vector<16x256xf32>, vector<8x256xf32> -> vector<8x256xf32>
      %c0_22 = arith.constant 0 : index
      %c0_23 = arith.constant 0 : index
      %38 = vector.load %arg4[%c0_22, %c0_23] : memref<32x1xf32, #tpu.memory_space<vmem>>, vector<8x1xf32>
      %39 = vector.broadcast %38 : vector<8x1xf32> to vector<8x256xf32>
      %40 = arith.addf %37, %39 : vector<8x256xf32>
      %c0_24 = arith.constant 0 : index
      %c0_25 = arith.constant 0 : index
      %41 = vector.load %arg8[%c0_24, %c0_25] : memref<8x256xf32, #tpu.memory_space<vmem>>, vector<8x256xf32>
      tpu.vector_store %arg8[%c0_24, %c0_25], %40 {strides = array<i32>} : memref<8x256xf32, #tpu.memory_space<vmem>>, vector<8x256xf32>,
      %c8 = arith.constant 8 : index
      %c0_26 = arith.constant 0 : index
      %42 = vector.load %arg3[%c8, %c0_26] : memref<32x16xf32, #tpu.memory_space<vmem>>, vector<8x16xf32>
      %cst_27 = arith.constant dense<0.000000e+00> : vector<8x256xf32>
      %43 = tpu.matmul %42, %35, %cst_27 {dimension_numbers = #tpu.dot_dimension_numbers<[1], [0], [0], [1], [0, 0, 1, 1], [], []>} : vector<8x16xf32>, vector<16x256xf32>, vector<8x256xf32> -> vector<8x256xf32>
      %c8_28 = arith.constant 8 : index
      %c0_29 = arith.constant 0 : index
      %44 = vector.load %arg4[%c8_28, %c0_29] : memref<32x1xf32, #tpu.memory_space<vmem>>, vector<8x1xf32>
      %45 = vector.broadcast %44 : vector<8x1xf32> to vector<8x256xf32>
      %46 = arith.addf %43, %45 : vector<8x256xf32>
      %c0_30 = arith.constant 0 : index
      %c0_31 = arith.constant 0 : index
      %47 = vector.load %arg9[%c0_30, %c0_31] : memref<8x256xf32, #tpu.memory_space<vmem>>, vector<8x256xf32>
      tpu.vector_store %arg9[%c0_30, %c0_31], %46 {strides = array<i32>} : memref<8x256xf32, #tpu.memory_space<vmem>>, vector<8x256xf32>,
      %c16 = arith.constant 16 : index
      %c0_32 = arith.constant 0 : index
      %48 = vector.load %arg3[%c16, %c0_32] : memref<32x16xf32, #tpu.memory_space<vmem>>, vector<16x16xf32>
      %cst_33 = arith.constant dense<0.000000e+00> : vector<16x256xf32>
      %49 = tpu.matmul %48, %35, %cst_33 {dimension_numbers = #tpu.dot_dimension_numbers<[1], [0], [0], [1], [0, 0, 1, 1], [], []>} : vector<16x16xf32>, vector<16x256xf32>, vector<16x256xf32> -> vector<16x256xf32>
      %c16_34 = arith.constant 16 : index
      %c0_35 = arith.constant 0 : index
      %50 = vector.load %arg4[%c16_34, %c0_35] : memref<32x1xf32, #tpu.memory_space<vmem>>, vector<16x1xf32>
      %51 = vector.broadcast %50 : vector<16x1xf32> to vector<16x256xf32>
      %52 = arith.addf %49, %51 : vector<16x256xf32>
      %c0_36 = arith.constant 0 : index
      %c0_37 = arith.constant 0 : index
      %53 = vector.load %arg10[%c0_36, %c0_37] : memref<16x256xf32, #tpu.memory_space<vmem>>, vector<16x256xf32>
      tpu.vector_store %arg10[%c0_36, %c0_37], %52 {strides = array<i32>} : memref<16x256xf32, #tpu.memory_space<vmem>>, vector<16x256xf32>,
    } else {
    }
    %c256_i32 = arith.constant 256 : i32
    %3 = arith.muli %arg1, %c256_i32 : i32
    %4 = tpu.assume_multiple %3, 256 : i32
    %c0 = arith.constant 0 : index
    %5 = arith.index_cast %4 : i32 to index
    %6 = vector.load %arg8[%c0, %5] : memref<8x256xf32, #tpu.memory_space<vmem>>, vector<8x256xf32>
    %c0_1 = arith.constant 0 : index
    %7 = arith.index_cast %4 : i32 to index
    %8 = vector.load %arg7[%c0_1, %7] : memref<16x256xf32, #tpu.memory_space<vmem>>, vector<16x256xf32>
    %c0_2 = arith.constant 0 : index
    %c0_3 = arith.constant 0 : index
    %9 = vector.load %arg9[%c0_2, %c0_3] : memref<8x256xf32, #tpu.memory_space<vmem>>, vector<8x256xf32>
    %cst = arith.constant dense<0.000000e+00> : vector<256x256xf32>
    %10 = tpu.matmul %6, %9, %cst {dimension_numbers = #tpu.dot_dimension_numbers<[0], [0], [1], [1], [0, 1, 1, 1], [], []>} : vector<8x256xf32>, vector<8x256xf32>, vector<256x256xf32> -> vector<256x256xf32>
    %cst_4 = arith.constant dense<0xFF800000> : vector<256xf32>
    %11 = vector.multi_reduction <maximumf>, %10, %cst_4 [1] : vector<256x256xf32> to vector<256xf32>
    %12 = vector.shape_cast %11 : vector<256xf32> to vector<256x1xf32>
    %13 = vector.broadcast %12 : vector<256x1xf32> to vector<256x256xf32>
    %14 = arith.subf %10, %13 : vector<256x256xf32>
    %15 = math.exp %14 : vector<256x256xf32>
    %cst_5 = arith.constant dense<0.000000e+00> : vector<256xf32>
    %16 = vector.multi_reduction <add>, %15, %cst_5 [1] : vector<256x256xf32> to vector<256xf32>
    %17 = vector.shape_cast %16 : vector<256xf32> to vector<256x1xf32>
    %c0_6 = arith.constant 0 : index
    %c0_7 = arith.constant 0 : index
    %18 = vector.load %arg10[%c0_6, %c0_7] : memref<16x256xf32, #tpu.memory_space<vmem>>, vector<16x256xf32>
    %cst_8 = arith.constant dense<0.000000e+00> : vector<16x256xf32>
    %19 = tpu.matmul %18, %15, %cst_8 {dimension_numbers = #tpu.dot_dimension_numbers<[1], [1], [0], [0], [0, 0, 1, 0], [], []>} : vector<16x256xf32>, vector<256x256xf32>, vector<16x256xf32> -> vector<16x256xf32>
    %20 = tpu.reciprocal %17 : vector<256x1xf32> -> vector<256x1xf32>
    %21 = tpu.transpose %20, [1, 0] : vector<256x1xf32> -> vector<1x256xf32>
    %22 = vector.broadcast %21 : vector<1x256xf32> to vector<16x256xf32>
    %23 = arith.mulf %19, %22 : vector<16x256xf32>
    %c0_9 = arith.constant 0 : index
    %24 = memref.load %arg5[%c0_9] : memref<1xf32, #tpu.memory_space<smem>>
    %25 = vector.broadcast %24 : f32 to vector<16x256xf32>
    %26 = arith.mulf %25, %23 : vector<16x256xf32>
    %27 = arith.addf %26, %8 : vector<16x256xf32>
    %c0_10 = arith.constant 0 : index
    %c0_11 = arith.constant 0 : index
    %c0_12 = arith.constant 0 : index
    %28 = vector.load %arg6[%c0_10, %c0_11, %c0_12] : memref<1x16x256xf32, #tpu.memory_space<vmem>>, vector<1x16x256xf32>
    %29 = vector.shape_cast %28 : vector<1x16x256xf32> to vector<16x256xf32>
    %30 = vector.shape_cast %27 : vector<16x256xf32> to vector<1x16x256xf32>
    tpu.vector_store %arg6[%c0_10, %c0_11, %c0_12], %30 {strides = array<i32>} : memref<1x16x256xf32, #tpu.memory_space<vmem>>, vector<1x16x256xf32>,
    return
  }
  func.func @transform_1(%arg0: i32, %arg1: i32) -> (i32, i32) {
    %c0_i32 = arith.constant 0 : i32
    %c0_i32_0 = arith.constant 0 : i32
    %c0_i32_1 = arith.constant 0 : i32
    return %c0_i32, %c0_i32_0 : i32, i32
  }
  func.func @transform_2(%arg0: i32, %arg1: i32) -> (i32, i32) {
    %c0_i32 = arith.constant 0 : i32
    %c0_i32_0 = arith.constant 0 : i32
    %c0_i32_1 = arith.constant 0 : i32
    return %c0_i32, %c0_i32_0 : i32, i32
  }
  func.func @transform_3(%arg0: i32, %arg1: i32) -> i32 {
    %c0_i32 = arith.constant 0 : i32
    %c0_i32_0 = arith.constant 0 : i32
    return %c0_i32 : i32
  }
  func.func @transform_4(%arg0: i32, %arg1: i32) -> (i32, i32, i32) {
    %c0_i32 = arith.constant 0 : i32
    %c0_i32_0 = arith.constant 0 : i32
    return %arg0, %c0_i32, %arg1 : i32, i32, i32
  }
}

</mosaic_0001>

<bundles_post_ra>
// kernel: tpu_custom_call.1
= control target key start
LH: loop header
LB: loop body
LE: loop exit
PB: predicated region body
PF: predicated region fallthrough
CT: control target
= control target key end

     0   :  { %s3607_s0 = inlined_call_operand.vmem [shape: f32[2,16,256], index: 0, kind: input, shape index: {}]   ;;  %s3608_s1 = inlined_call_operand.vmem [shape: f32[32,16], index: 1, kind: input, shape index: {}]   ;;  %s3609_s2 = inlined_call_operand.vmem [shape: f32[32,1], index: 2, kind: input, shape index: {}]   ;;  %s3610_s3 = inlined_call_operand.<no memory space> [shape: f32[1], index: 3, kind: input, shape index: {}]   ;;  %s3611_s4 = inlined_call_operand.hbm [shape: f32[2,16,256], index: 4, kind: output, shape index: {}]  }
   0x1   :  { %9 = sst [smem:[#allocation7]] %s3610_s3 }
   0x2   :  { %10 = vsyncpa [#allocation9], 0 }
   0x3   :  { %12 = vsyncpa [#allocation9 + $0x1], 0  ;;  %s2344_s17 = smov 0   ;;  %s2346_s18 = smov 0  }
   0x4   :  { %s2348_s19 = smov 0   ;;  %s2350_s20 = smov 0  }
   0x5   :  { %s2352_s21 = smov 0   ;;  %s2354_s22 = smov 0  }
   0x6 LB: > { %s1889_s3 = sadd.s32 4294967295, %s2311_s22   ;;  %s1890_s23 = sadd.s32 4294967294, %s2311_s22   ;;  %s2311_s22 = sphi %s2354_s22, %s18_s22   ;;  %s2307_s21 = sphi %s2352_s21, %s3708_s21   ;;  %s2303_s20 = sphi %s2350_s20, %s3707_s20   ;;  %s2299_s19 = sphi %s2348_s19, %s3706_s19   ;;  %s2295_s18 = sphi %s2346_s18, %s3705_s18   ;;  %s2291_s17 = sphi %s2344_s17, %s3704_s17  }
   0x7   : > { %s30_s24 = sadd.s32 1, %s2307_s21  ;;  %s102_s25 = sadd.s32 1, %s2299_s19 }
   0x8   : > { %p32_p0 = scmp.ge.s32.totalorder %s30_s24, 2  ;;  %p112_p1 = scmp.ne.s32.totalorder %s2299_s19, %s2295_s18 }
   0x9   : > { %p113_p2 = scmp.eq.s32.totalorder %s1889_s3, 1  ;;  %p118_p3 = scmp.ne.s32.totalorder %s2295_s18, %s2291_s17 }
   0xa   : > { %s3710_s24 = smov (%p32_p0, %s30_s24), 0  ;;  %p119_p5 = scmp.eq.s32.totalorder %s1890_s23, 1 }
   0xb   : > { %p2384_p4 = por %p113_p2, %p112_p1  ;;  %s97_s27 = ssub.s32 %s2307_s21, %s3710_s24 }
   0xc   : > { %p1892_p6 = scmp.ge.s32.totalorder %s2311_s22, 1  ;;  %p100_p7 = scmp.eq.s32.totalorder %s97_s27, 0 }
   0xd   : > { %p2391_p8 = por %p119_p5, %p118_p3  ;;  %p146_p9 = scmp.lt.s32.totalorder %s2311_s22, 3 }
   0xe   : > { %s2397_s29 = scalar_select %p100_p7, %s2299_s19, %s102_s25  }
   0xf   : > { %p147_p10 = pnand %p1892_p6, %p146_p9 }
  0x11   : > { %150 = sbr.rel (%p147_p10) target bundleno = 1111 (0x457), region = 32 }
  0x16   : > { %s162_s30 = sand.u32 1, %s2295_s18   ;;  %s1974_s5 = sshll.u32 %s2303_s20, 5 }
  0x17   : > { %s1893_s6 = sshll.u32 %s162_s30, 5  ;;  %s172_s9 = scalar_lea.vmem %s3607_s0, %s1974_s5 }
  0x18   : > { %v2408_v0 = vld [vmem:[%s172_s9] sm:$0xff]  ;;  %v2410_v1 = vld [vmem:[%s172_s9 + $0x8] sm:$0xff]  ;;  %v2412_v2 = vld [vmem:[%s172_s9 + $0x10] sm:$0xff]  ;;  %s2416_s10 = scalar_lea.vmem [#allocation8], %s1893_s6 }
  0x19   : > { %3628 = vst [vmem:[#allocation13_spill] sm:$0xff] %v2408_v0  ;;  %v2414_v3 = vld [vmem:[%s172_s9 + $0x18] sm:$0xff] }
  0x1a   : > { %3629 = vst [vmem:[#allocation14_spill] sm:$0xff] %v2410_v1 }
  0x1b   : > { %3630 = vst [vmem:[#allocation15_spill] sm:$0xff] %v2412_v2 }
  0x1c   : > { %3631 = vst [vmem:[#allocation16_spill] sm:$0xff] %v2414_v3 }
  0x1d   : > { %196 = vsyncadd [#allocation6], 512 }
  0x1e   : > { %2283 = dma.done.wait [#allocation6], 512 }
  0x1f   : > { %2284 = vsyncadd [#allocation6], 4294966784  ;;  %230 = vmatpush.msra.mxu0 %v2412_v2  ;;  %250 = vmatpush.msra.mxu1 %v2414_v3  ;;  %v2313_v4 = vmov 0   ;;  %vm212_vm0 = vcmask 130048   ;;  %v205_v5 = vld [vmem:[%s3608_s1] sm:$0xff]  ;;  %v258_v6 = vld [vmem:[%s3608_s1 + $0x8] sm:$0xff]  ;;  %s1808_s16 = scalar_lea.hbm %s3611_s4, %s1974_s5 }
  0x20   : > { %302 = vmatpush.msra.mxu3 %v2414_v3  ;;  %2037 = vset.pattern.permute.xlu0 %v2313_v4  ;;  %v206_v7 = vld [vmem:[%s3609_s2] sm:$0xff]  ;;  %v259_v8 = vld [vmem:[%s3609_s2 + $0x8] sm:$0xff]  ;;  %v310_v17 = vld [vmem:[%s3608_s1 + $0x10] sm:$0xff]  ;;  %vm459_vm1 = vcmask 64512   ;;  %s1780_s13 = sld [smem:[#allocation7]]  ;;  %s1809_s3 = sshll.u32 %s2416_s10, 4  ;;  %s1810_s3 = int_to_ptr.vmem [resolvable:$true] %s1809_s3 }
  0x21   : > { %231 = vmatpush.msra.mxu0 %v2408_v0  ;;  %251 = vmatpush.msra.mxu1 %v2410_v1  ;;  %v311_v18 = vld [vmem:[%s3608_s1 + $0x18] sm:$0xff]  ;;  %v312_v28 = vld [vmem:[%s3609_s2 + $0x10] sm:$0xff]  ;;  %s1811_s23 = sshll.u32 %s1808_s16, 4  ;;  %s1795_s20 = scalar_lea.sflag [#allocation9], %s162_s30  ;;  %s1812_s23 = int_to_ptr.hbm [resolvable:$true] %s1811_s23 }
  0x22   : > { %303 = vmatpush.msra.mxu3 %v2410_v1  ;;  %2038 = vset.pattern.permute.xlu2 %v2313_v4  ;;  %v313_v30 = vld [vmem:[%s3609_s2 + $0x18] sm:$0xff]  ;;  %s2245_s5 = sshra.s32 %s1812_s23, 4  ;;  %s2251_s7 = scalar_lea.hbm %s3611_s4, 64  ;;  %s2246_s5 = int_to_ptr.hbm [resolvable:$true] %s2245_s5 }
  0x23   : > { %282 = vmatpush.msrb.mxu0 %v2412_v2  ;;  %367 = vmatpush.msrb.mxu1 %v2414_v3  ;;  %s2247_s25 = scalar_lea.hbm %s2246_s5, 32  ;;  %p2252_p0 = scmp.lt.s32.totalorder %s2246_s5, %s3611_s4 }
  0x24   : > { %1896 = vmatmul.msk.f32.vlgmr.msra.gmra.mxu0 %vm212_vm0, %v205_v5  ;;  %1897 = vmatmul.msk.f32.vlgmr.msra.gmra.mxu1 %vm212_vm0, %v205_v5  ;;  %p2248_p11 = scmp.ne.s32.totalorder %s2246_s5, %s2247_s25  ;;  %p2253_p1 = scmp.lt.s32.totalorder %s2251_s7, %s2247_s25 }
  0x25   : > { %283 = vmatpush.msrb.mxu0 %v2408_v0  ;;  %368 = vmatpush.msrb.mxu1 %v2410_v1 }
  0x26   : > { %1899 = vmatmul.msk.f32.vlgmr.msra.gmra.mxu3 %vm212_vm0, %v258_v6  ;;  %209 = vperm.xlu0 %2037, %v206_v7   ;;  %p2249_p12 = pnand %p2248_p11, %p2384_p4  ;;  %p2254_p2 = por %p2253_p1, %p2252_p0 }
  0x27   : > { %344 = vmatpush.msra.mxu0 %v2412_v2  ;;  %316 = vperm.xlu2 %2038, %v312_v28  }
  0x28   : > { %p2250_p13 = pneg %p2249_p12 }
  0x29   : > { %345 = vmatpush.msra.mxu0 %v2408_v0 }
  0x2a   : > { %p2255_p3 = pnand %p2254_p2, %p2250_p13 }
  0x2c   : > { %1898 = vmatmul.msk.f32.vlgmr.msrb.gmra.mxu0 %vm212_vm0, %v258_v6  ;;  %1902 = vmatmul.msk.f32.vlgmr.msrb.gmra.mxu1 %vm212_vm0, %v310_v17 }
  0x2e   : > { %262 = vperm.xlu0 %2037, %v259_v8  }
  0x2f   : > { %321 = vperm.xlu2 %2038, %v313_v30  }
  0x34   : > { %1900 = vmatmul.msk.f32.vlgmr.msra.gmra.mxu0 %vm212_vm0, %v310_v17  ;;  %1903 = vmatmul.msk.f32.gmra.mxu1 %vm212_vm0, %v311_v18 }
  0x3c   : > { %1901 = vmatmul.msk.f32.gmra.mxu0 %vm212_vm0, %v311_v18 }
  0x81   : > { %v317_v51 = vpop.permute.xlu2 %316 }
  0x98   : > { %v210_v9 = vpop.permute.xlu0 %209 }
  0xa0   : > { %v263_v12 = vpop.permute.xlu0 %262 }
  0xa1   : > { %v233_v10 = vpop.f32.mrf.mxu0  ;;  %v253_v19 = vpop.f32.mrf.mxu1 }
  0xa2   : > { %v234_v11 = vadd.f32 %v233_v10, %v210_v9  ;;  %v254_v20 = vadd.f32 %v253_v19, %v210_v9 }
  0xa4   : > { %395 = vxpose.xlu1.b32.start.end [1/1] (short) %v234_v11, 128 }
  0xa9   : > { %v305_v13 = vpop.f32.mrf.mxu3  ;;  %v285_v15 = vpop.f32.mrf.mxu0 }
  0xaa   : > { %v306_v14 = vadd.f32 %v305_v13, %v263_v12  ;;  %v286_v16 = vadd.f32 %v285_v15, %v263_v12  ;;  %v370_v38 = vpop.f32.mrf.mxu1 }
  0xab   : > { %v2516_v53 = vadd.f32 %v370_v38, %v317_v51 }
  0xac   : > { %684 = vmatpush.msra.mxu1 %v306_v14  ;;  %1977 = vmatpush.msrb.mxu3 %v306_v14 }
  0xad   : > { %571 = vmatpush.msrb.mxu0 %v286_v16  ;;  %1976 = vmatpush.msra.mxu2 %v286_v16 }
  0xb1   : > { %v347_v37 = vpop.f32.mrf.mxu0 }
  0xb2   : > { %v2494_v41 = vpop.f32.mrf.mxu1  ;;  %v2514_v52 = vadd.f32 %v347_v37, %v317_v51 }
  0xb3   : > { %3633 = vst [vmem:[#allocation18_spill] sm:$0xff] %v2494_v41 }
  0xb9   : > { %v2492_v40 = vpop.f32.mrf.mxu0 }
  0xba   : > { %3632 = vst [vmem:[#allocation17_spill] sm:$0xff] %v2492_v40 }
 0x124   : > { %427 = vxpose.xlu1.b32.start.end [1/1] (short) %v254_v20, 128 }
 0x148   : > { %v411_v21 = vpop.trf.xlu1 }
 0x149   : > { %1904 = vmatmul.msk.f32.vlgmr.msrb.gmra.mxu0 %vm459_vm1, %v411_v21  ;;  %1936 = vmatmul.msk.f32.vlgmr.msra.gmra.mxu1 %vm459_vm1, %v411_v21 }
 0x150   : > { %v412_v22 = vpop.trf.xlu1 }
 0x151   : > { %1905 = vmatmul.msk.f32.gmra.mxu0 %vm459_vm1, %v412_v22  ;;  %1937 = vmatmul.msk.f32.gmra.mxu1 %vm459_vm1, %v412_v22 }
 0x158   : > { %v413_v23 = vpop.trf.xlu1 }
 0x159   : > { %1906 = vmatmul.msk.f32.gmra.mxu0 %vm459_vm1, %v413_v23  ;;  %1938 = vmatmul.msk.f32.gmra.mxu1 %vm459_vm1, %v413_v23 }
 0x160   : > { %v414_v24 = vpop.trf.xlu1 }
 0x161   : > { %1907 = vmatmul.msk.f32.gmra.mxu0 %vm459_vm1, %v414_v24  ;;  %1939 = vmatmul.msk.f32.gmra.mxu1 %vm459_vm1, %v414_v24 }
 0x168   : > { %v415_v25 = vpop.trf.xlu1 }
 0x169   : > { %1908 = vmatmul.msk.f32.gmra.mxu0 %vm459_vm1, %v415_v25  ;;  %1940 = vmatmul.msk.f32.gmra.mxu1 %vm459_vm1, %v415_v25 }
 0x170   : > { %v416_v26 = vpop.trf.xlu1 }
 0x171   : > { %1909 = vmatmul.msk.f32.gmra.mxu0 %vm459_vm1, %v416_v26  ;;  %1941 = vmatmul.msk.f32.gmra.mxu1 %vm459_vm1, %v416_v26 }
 0x178   : > { %v417_v27 = vpop.trf.xlu1 }
 0x179   : > { %1910 = vmatmul.msk.f32.gmra.mxu0 %vm459_vm1, %v417_v27  ;;  %1942 = vmatmul.msk.f32.gmra.mxu1 %vm459_vm1, %v417_v27 }
 0x180   : > { %v418_v29 = vpop.trf.xlu1 }
 0x181   : > { %1911 = vmatmul.msk.f32.gmra.mxu0 %vm459_vm1, %v418_v29  ;;  %1943 = vmatmul.msk.f32.gmra.mxu1 %vm459_vm1, %v418_v29 }
 0x188   : > { %v419_v31 = vpop.trf.xlu1 }
 0x189   : > { %1912 = vmatmul.msk.f32.vlgmr.msra.gmra.mxu2 %vm459_vm1, %v419_v31  ;;  %1944 = vmatmul.msk.f32.gmra.mxu1 %vm459_vm1, %v419_v31 }
 0x190   : > { %v420_v32 = vpop.trf.xlu1 }
 0x191   : > { %1913 = vmatmul.msk.f32.gmra.mxu2 %vm459_vm1, %v420_v32  ;;  %1945 = vmatmul.msk.f32.gmra.mxu1 %vm459_vm1, %v420_v32 }
 0x198   : > { %v421_v33 = vpop.trf.xlu1 }
 0x199   : > { %1914 = vmatmul.msk.f32.gmra.mxu2 %vm459_vm1, %v421_v33  ;;  %1946 = vmatmul.msk.f32.vlgmr.msrb.gmra.mxu3 %vm459_vm1, %v421_v33 }
 0x1a0   : > { %v422_v34 = vpop.trf.xlu1 }
 0x1a1   : > { %1915 = vmatmul.msk.f32.gmra.mxu2 %vm459_vm1, %v422_v34  ;;  %1947 = vmatmul.msk.f32.gmra.mxu3 %vm459_vm1, %v422_v34 }
 0x1a8   : > { %v423_v35 = vpop.trf.xlu1 }
 0x1a9   : > { %1916 = vmatmul.msk.f32.gmra.mxu2 %vm459_vm1, %v423_v35  ;;  %1948 = vmatmul.msk.f32.gmra.mxu3 %vm459_vm1, %v423_v35 }
 0x1b0   : > { %v424_v36 = vpop.trf.xlu1 }
 0x1b1   : > { %1917 = vmatmul.msk.f32.gmra.mxu2 %vm459_vm1, %v424_v36  ;;  %1949 = vmatmul.msk.f32.gmra.mxu3 %vm459_vm1, %v424_v36 }
 0x1b8   : > { %v425_v39 = vpop.trf.xlu1 }
 0x1b9   : > { %1918 = vmatmul.msk.f32.gmra.mxu2 %vm459_vm1, %v425_v39  ;;  %1950 = vmatmul.msk.f32.gmra.mxu3 %vm459_vm1, %v425_v39 }
 0x1c0   : > { %v426_v42 = vpop.trf.xlu1 }
 0x1c1   : > { %1919 = vmatmul.msk.f32.gmra.mxu2 %vm459_vm1, %v426_v42  ;;  %1951 = vmatmul.msk.f32.gmra.mxu3 %vm459_vm1, %v426_v42 }
 0x1c6   : > { %v2498_v43 = vpop.f32.mrf.mxu0  ;;  %v2500_v44 = vpop.f32.mrf.mxu1 }
 0x1c7   : > { %v782_v45 = vmax.f32 %v2498_v43, %v2500_v44 }
 0x1c8   : > { %v443_v46 = vpop.trf.xlu1 }
 0x1c9   : > { %783 = vmax.xlane.f32.xlu0 %v782_v45  ;;  %1920 = vmatmul.msk.f32.gmra.mxu2 %vm459_vm1, %v443_v46 }
 0x1ca   : > { %1952 = vmatmul.msk.f32.gmra.mxu3 %vm459_vm1, %v443_v46 }
 0x1ce   : > { %v2506_v47 = vpop.f32.mrf.mxu0  ;;  %v2508_v48 = vpop.f32.mrf.mxu1 }
 0x1cf   : > { %v785_v49 = vmax.f32 %v2506_v47, %v2508_v48 }
 0x1d0   : > { %v444_v50 = vpop.trf.xlu1 }
 0x1d1   : > { %786 = vmax.xlane.f32.xlu2 %v785_v49  ;;  %1921 = vmatmul.msk.f32.gmra.mxu2 %vm459_vm1, %v444_v50 }
 0x1d2   : > { %1953 = vmatmul.msk.f32.gmra.mxu3 %vm459_vm1, %v444_v50 }
 0x1d6   : > { %v2518_v54 = vpop.f32.mrf.mxu0  ;;  %v2520_v55 = vpop.f32.mrf.mxu1 }
 0x1d7   : > { %v788_v56 = vmax.f32 %v2518_v54, %v2520_v55 }
 0x1d8   : > { %v445_v57 = vpop.trf.xlu1 }
 0x1d9   : > { %789 = vmax.xlane.f32.xlu2 %v788_v56  ;;  %1922 = vmatmul.msk.f32.gmra.mxu2 %vm459_vm1, %v445_v57 }
 0x1da   : > { %1954 = vmatmul.msk.f32.gmra.mxu3 %vm459_vm1, %v445_v57 }
 0x1de   : > { %v2526_v58 = vpop.f32.mrf.mxu0  ;;  %v2528_v59 = vpop.f32.mrf.mxu1 }
 0x1df   : > { %v791_v60 = vmax.f32 %v2526_v58, %v2528_v59 }
 0x1e0   : > { %v446_v61 = vpop.trf.xlu1 }
 0x1e1   : > { %792 = vmax.xlane.f32.xlu0 %v791_v60  ;;  %1923 = vmatmul.msk.f32.gmra.mxu2 %vm459_vm1, %v446_v61 }
 0x1e2   : > { %1955 = vmatmul.msk.f32.gmra.mxu3 %vm459_vm1, %v446_v61 }
 0x1e6   : > { %v2534_v62 = vpop.f32.mrf.mxu0  ;;  %v2536_v63 = vpop.f32.mrf.mxu1 }
 0x1e7   : > { %v794_v4 = vmax.f32 %v2534_v62, %v2536_v63 }
 0x1e8   : > { %v447_v5 = vpop.trf.xlu1 }
 0x1e9   : > { %795 = vmax.xlane.f32.xlu2 %v794_v4  ;;  %1924 = vmatmul.msk.f32.gmra.mxu2 %vm459_vm1, %v447_v5 }
 0x1ea   : > { %1956 = vmatmul.msk.f32.gmra.mxu3 %vm459_vm1, %v447_v5 }
 0x1ee   : > { %v2542_v6 = vpop.f32.mrf.mxu0  ;;  %v2544_v7 = vpop.f32.mrf.mxu1 }
 0x1ef   : > { %v797_v8 = vmax.f32 %v2542_v6, %v2544_v7 }
 0x1f0   : > { %v448_v9 = vpop.trf.xlu1 }
 0x1f1   : > { %798 = vmax.xlane.f32.xlu0 %v797_v8  ;;  %1925 = vmatmul.msk.f32.gmra.mxu2 %vm459_vm1, %v448_v9 }
 0x1f2   : > { %1957 = vmatmul.msk.f32.gmra.mxu3 %vm459_vm1, %v448_v9  ;;  %v2636_v9 = vpop.permute.xlu2 %321 }
 0x1f3   : > { %3634 = vst [vmem:[#allocation19_spill] sm:$0xff] %v2636_v9 }
 0x1f6   : > { %v2550_v10 = vpop.f32.mrf.mxu0  ;;  %v2552_v11 = vpop.f32.mrf.mxu1 }
 0x1f7   : > { %v800_v12 = vmax.f32 %v2550_v10, %v2552_v11 }
 0x1f8   : > { %v449_v13 = vpop.trf.xlu1 }
 0x1f9   : > { %801 = vmax.xlane.f32.xlu2 %v800_v12  ;;  %1926 = vmatmul.msk.f32.gmra.mxu2 %vm459_vm1, %v449_v13 }
 0x1fa   : > { %1958 = vmatmul.msk.f32.gmra.mxu3 %vm459_vm1, %v449_v13 }
 0x1fe   : > { %v2558_v14 = vpop.f32.mrf.mxu0  ;;  %v2560_v15 = vpop.f32.mrf.mxu1 }
 0x1ff   : > { %v803_v16 = vmax.f32 %v2558_v14, %v2560_v15 }
 0x200   : > { %v450_v17 = vpop.trf.xlu1 }
 0x201   : > { %804 = vmax.xlane.f32.xlu2 %v803_v16  ;;  %1927 = vmatmul.msk.f32.gmra.mxu2 %vm459_vm1, %v450_v17 }
 0x202   : > { %1959 = vmatmul.msk.f32.gmra.mxu3 %vm459_vm1, %v450_v17 }
 0x206   : > { %v2567_v19 = vpop.f32.mrf.mxu1 }
 0x208   : > { %v451_v18 = vpop.trf.xlu1 }
 0x209   : > { %1928 = vmatmul.msk.f32.gmra.mxu2 %vm459_vm1, %v451_v18 }
 0x20a   : > { %1960 = vmatmul.msk.f32.gmra.mxu3 %vm459_vm1, %v451_v18 }
 0x20c   : > { %v2570_v20 = vpop.f32.mrf.mxu2 }
 0x20d   : > { %v806_v21 = vmax.f32 %v2570_v20, %v2567_v19 }
 0x20e   : > { %v2576_v23 = vpop.f32.mrf.mxu1 }
 0x20f   : > { %807 = vmax.xlane.f32.xlu2 %v806_v21 }
 0x210   : > { %v452_v22 = vpop.trf.xlu1 }
 0x211   : > { %1929 = vmatmul.msk.f32.gmra.mxu2 %vm459_vm1, %v452_v22 }
 0x212   : > { %1961 = vmatmul.msk.f32.gmra.mxu3 %vm459_vm1, %v452_v22 }
 0x214   : > { %v2578_v24 = vpop.f32.mrf.mxu2 }
 0x215   : > { %v809_v25 = vmax.f32 %v2578_v24, %v2576_v23 }
 0x217   : > { %810 = vmax.xlane.f32.xlu2 %v809_v25 }
 0x218   : > { %v453_v32 = vpop.trf.xlu1 }
 0x219   : > { %1930 = vmatmul.msk.f32.gmra.mxu2 %vm459_vm1, %v453_v32 }
 0x21a   : > { %1962 = vmatmul.msk.f32.gmra.mxu3 %vm459_vm1, %v453_v32 }
 0x21c   : > { %v2582_v26 = vpop.f32.mrf.mxu2  ;;  %v2584_v27 = vpop.f32.mrf.mxu3 }
 0x21d   : > { %v812_v28 = vmax.f32 %v2582_v26, %v2584_v27 }
 0x21f   : > { %813 = vmax.xlane.f32.xlu2 %v812_v28 }
 0x220   : > { %v454_v36 = vpop.trf.xlu1 }
 0x221   : > { %1931 = vmatmul.msk.f32.gmra.mxu2 %vm459_vm1, %v454_v36 }
 0x222   : > { %1963 = vmatmul.msk.f32.gmra.mxu3 %vm459_vm1, %v454_v36 }
 0x224   : > { %v2588_v29 = vpop.f32.mrf.mxu2  ;;  %v2590_v30 = vpop.f32.mrf.mxu3 }
 0x225   : > { %v815_v31 = vmax.f32 %v2588_v29, %v2590_v30 }
 0x227   : > { %816 = vmax.xlane.f32.xlu2 %v815_v31 }
 0x228   : > { %v455_v42 = vpop.trf.xlu1 }
 0x229   : > { %1932 = vmatmul.msk.f32.gmra.mxu2 %vm459_vm1, %v455_v42 }
 0x22a   : > { %1964 = vmatmul.msk.f32.gmra.mxu3 %vm459_vm1, %v455_v42 }
 0x22c   : > { %v2596_v33 = vpop.f32.mrf.mxu2  ;;  %v2598_v34 = vpop.f32.mrf.mxu3 }
 0x22d   : > { %v818_v35 = vmax.f32 %v2596_v33, %v2598_v34 }
 0x22f   : > { %819 = vmax.xlane.f32.xlu0 %v818_v35 }
 0x230   : > { %v456_v57 = vpop.trf.xlu1 }
 0x231   : > { %1933 = vmatmul.msk.f32.gmra.mxu2 %vm459_vm1, %v456_v57 }
 0x232   : > { %1965 = vmatmul.msk.f32.gmra.mxu3 %vm459_vm1, %v456_v57 }
 0x234   : > { %v2604_v37 = vpop.f32.mrf.mxu2  ;;  %v2606_v38 = vpop.f32.mrf.mxu3 }
 0x235   : > { %v821_v39 = vmax.f32 %v2604_v37, %v2606_v38 }
 0x237   : > { %822 = vmax.xlane.f32.xlu0 %v821_v39 }
 0x238   : > { %v457_v4 = vpop.trf.xlu1 }
 0x239   : > { %1934 = vmatmul.msk.f32.gmra.mxu2 %vm459_vm1, %v457_v4 }
 0x23a   : > { %1966 = vmatmul.msk.f32.gmra.mxu3 %vm459_vm1, %v457_v4 }
 0x23c   : > { %v2612_v45 = vpop.f32.mrf.mxu2  ;;  %v2614_v46 = vpop.f32.mrf.mxu3 }
 0x23d   : > { %v824_v49 = vmax.f32 %v2612_v45, %v2614_v46  ;;  %v784_v41 = vpop.xlane.xlu0 %783 }
 0x23e   : > { %v878_v40 = vsub.f32 %v2498_v43, %v784_v41 }
 0x23f   : > { %825 = vmax.xlane.f32.xlu2 %v824_v49 }
 0x240   : > { %v458_v12 = vpop.trf.xlu1 }
 0x241   : > { %1935 = vmatmul.msk.f32.gmra.mxu2 %vm459_vm1, %v458_v12 }
 0x242   : > { %1967 = vmatmul.msk.f32.gmra.mxu3 %vm459_vm1, %v458_v12 }
 0x244   : > { %v2618_v50 = vpop.f32.mrf.mxu2  ;;  %v2620_v51 = vpop.f32.mrf.mxu3 }
 0x245   : > { %v827_v56 = vmax.f32 %v2618_v50, %v2620_v51  ;;  %v787_v17 = vpop.xlane.xlu2 %786 }
 0x247   : > { %828 = vmax.xlane.f32.xlu0 %v827_v56 }
 0x24c   : > { %v2626_v60 = vpop.f32.mrf.mxu2 }
 0x24d   : > { %v2628_v61 = vpop.f32.mrf.mxu3  ;;  %v790_v22 = vpop.xlane.xlu2 %789 }
 0x254   : > { %v2632_v5 = vpop.f32.mrf.mxu2 }
 0x255   : > { %v2634_v8 = vpop.f32.mrf.mxu3 }
 0x25c   : > { %v2640_v13 = vpop.f32.mrf.mxu2  ;;  %v796_v31 = vpop.xlane.xlu2 %795 }
 0x25d   : > { %v2642_v16 = vpop.f32.mrf.mxu3 }
 0x264   : > { %v2644_v18 = vpop.f32.mrf.mxu2 }
 0x265   : > { %v2646_v21 = vpop.f32.mrf.mxu3 }
 0x26c   : > { %v2648_v25 = vpop.f32.mrf.mxu2  ;;  %v2656_v36 = vpop.xlane.xlu2 %801 }
 0x26d   : > { %v2650_v28 = vpop.f32.mrf.mxu3 }
 0x274   : > { %v2652_v32 = vpop.f32.mrf.mxu2  ;;  %v2664_v56 = vpop.xlane.xlu2 %804 }
 0x275   : > { %3635 = vst [vmem:[#allocation20_spill] sm:$0xff] %v2652_v32  ;;  %v2654_v35 = vpop.f32.mrf.mxu3 }
 0x276   : > { %3636 = vst [vmem:[#allocation21_spill] sm:$0xff] %v2654_v35  ;;  %v845_v2 = vmax.f32 %v2652_v32, %v2654_v35  ;;  %v830_v32 = vmax.f32 %v2626_v60, %v2628_v61 }
 0x27c   : > { %v2658_v39 = vpop.f32.mrf.mxu2 }
 0x27d   : > { %v2660_v42 = vpop.f32.mrf.mxu3 }
 0x27e   : > { %3637 = vst [vmem:[#allocation22_spill] sm:$0xff] %v2660_v42  ;;  %v848_v35 = vmax.f32 %v2658_v39, %v2660_v42 }
 0x282   : > { %v2672_v3 = vpop.xlane.xlu2 %807 }
 0x284   : > { %v2662_v49 = vpop.f32.mrf.mxu2 }
 0x285   : > { %3638 = vst [vmem:[#allocation23_spill] sm:$0xff] %v2662_v49  ;;  %v2666_v57 = vpop.f32.mrf.mxu3 }
 0x286   : > { %3639 = vst [vmem:[#allocation24_spill] sm:$0xff] %v2666_v57  ;;  %v851_v4 = vmax.f32 %v2662_v49, %v2666_v57  ;;  %v839_v49 = vmax.f32 %v2644_v18, %v2646_v21 }
 0x288   : > { %852 = vmax.xlane.f32.xlu0 %v851_v4  ;;  %v879_v4 = vsub.f32 %v2500_v44, %v784_v41  ;;  %v882_v41 = vsub.f32 %v2518_v54, %v790_v22  ;;  %v883_v44 = vsub.f32 %v2520_v55, %v790_v22  ;;  %v880_v54 = vsub.f32 %v2506_v47, %v787_v17 }
 0x289   : > { %v881_v55 = vsub.f32 %v2508_v48, %v787_v17  ;;  %v886_v22 = vsub.f32 %v2534_v62, %v796_v31 }
 0x28a   : > { %v944_v43 = vmul.f32 1.442695, %v879_v4 }
 0x28c   : > { %v2670_v12 = vpop.f32.mrf.mxu2 }
 0x28d   : > { %3640 = vst [vmem:[#allocation25_spill] sm:$0xff] %v2670_v12  ;;  %v2674_v1 = vpop.f32.mrf.mxu3 }
 0x28e   : > { %3641 = vst [vmem:[#allocation26_spill] sm:$0xff] %v2674_v1  ;;  %v854_v0 = vmax.f32 %v2670_v12, %v2674_v1  ;;  %v793_v12 = vpop.xlane.xlu0 %792 }
 0x28f   : > { %v884_v62 = vsub.f32 %v2526_v58, %v793_v12  ;;  %v833_v58 = vmax.f32 %v2632_v5, %v2634_v8 }
 0x290   : > { %846 = vmax.xlane.f32.xlu0 %v845_v2  ;;  %855 = vmax.xlane.f32.xlu2 %v854_v0  ;;  %v2692_v2 = vpop.xlane.xlu2 %810  ;;  %v942_v0 = vmul.f32 1.442695, %v878_v40  ;;  %v952_v40 = vmul.f32 1.442695, %v883_v44  ;;  %v958_v44 = vmul.f32 1.442695, %v886_v22 }
 0x292   : > { %2039 = vpow2.f32 %v942_v0  ;;  %v887_v0 = vsub.f32 %v2536_v63, %v796_v31  ;;  %v890_v31 = vsub.f32 %v2550_v10, %v2656_v36 }
 0x293   : > { %2041 = vpow2.f32 %v944_v43  ;;  %v836_v43 = vmax.f32 %v2640_v13, %v2642_v16 }
 0x294   : > { %v2681_v9 = vpop.f32.mrf.mxu2  ;;  %v960_v47 = vmul.f32 1.442695, %v887_v0 }
 0x295   : > { %3642 = vst [vmem:[#allocation27_spill] sm:$0xff] %v2681_v9  ;;  %v2684_v57 = vpop.f32.mrf.mxu3 }
 0x296   : > { %3643 = vst [vmem:[#allocation28_spill] sm:$0xff] %v2684_v57  ;;  %v857_v1 = vmax.f32 %v2681_v9, %v2684_v57  ;;  %v842_v57 = vmax.f32 %v2648_v25, %v2650_v28  ;;  %v950_v9 = vmul.f32 1.442695, %v882_v41  ;;  %v948_v41 = vmul.f32 1.442695, %v881_v55 }
 0x298   : > { %840 = vmax.xlane.f32.xlu0 %v839_v49  ;;  %849 = vmax.xlane.f32.xlu2 %v848_v35  ;;  %v799_v35 = vpop.xlane.xlu0 %798  ;;  %v2700_v49 = vpop.xlane.xlu2 %813  ;;  %2043 = vpow2.f32 %v950_v9  ;;  %v885_v9 = vsub.f32 %v2528_v59, %v793_v12  ;;  %v966_v59 = vmul.f32 1.442695, %v890_v31 }
 0x299   : > { %858 = vmax.xlane.f32.xlu1 %v857_v1  ;;  %v2702_v1 = vpop.eup %2039  ;;  %2045 = vpow2.f32 %v952_v40  ;;  %v891_v40 = vsub.f32 %v2552_v11, %v2656_v36  ;;  %v888_v11 = vsub.f32 %v2542_v6, %v799_v35 }
 0x29a   : > { %v2705_v4 = vpop.eup %2041  ;;  %v956_v22 = vmul.f32 1.442695, %v885_v9  ;;  %v895_v9 = vsub.f32 %v2567_v19, %v2672_v3 }
 0x29b   : > { %v968_v10 = vmul.f32 1.442695, %v891_v40  ;;  %v962_v31 = vmul.f32 1.442695, %v888_v11 }
 0x29e   : > { %v2716_v48 = vpop.eup %2043 }
 0x29f   : > { %v2719_v63 = vpop.eup %2045 }
 0x2a0   : > { %831 = vmax.xlane.f32.xlu0 %v830_v32  ;;  %843 = vmax.xlane.f32.xlu2 %v842_v57  ;;  %v946_v32 = vmul.f32 1.442695, %v880_v54  ;;  %v1070_v57 = vadd.f32 %v2705_v4, %v2702_v1  ;;  %v2722_v17 = vpop.xlane.xlu2 %816  ;;  %v954_v54 = vmul.f32 1.442695, %v884_v62  ;;  %v1076_v55 = vadd.f32 %v2719_v63, %v2716_v48 }
 0x2a2   : > { %v2714_v42 = vpop.xlane.xlu0 %819  ;;  %2047 = vpow2.f32 %v946_v32 }
 0x2a3   : > { %2049 = vpow2.f32 %v948_v41 }
 0x2a4   : > { %2051 = vpow2.f32 %v958_v44  ;;  %v894_v44 = vsub.f32 %v2570_v20, %v2672_v3 }
 0x2a5   : > { %2053 = vpow2.f32 %v960_v47 }
 0x2a6   : > { %2055 = vpow2.f32 %v954_v54  ;;  %v974_v20 = vmul.f32 1.442695, %v894_v44 }
 0x2a7   : > { %2057 = vpow2.f32 %v956_v22 }
 0x2a8   : > { %1071 = vadd.xlane.f32.xlu0 %v1070_v57  ;;  %837 = vmax.xlane.f32.xlu2 %v836_v43  ;;  %v2732_v0 = vpop.eup %2047  ;;  %v889_v57 = vsub.f32 %v2544_v7, %v799_v35  ;;  %2059 = vpow2.f32 %v966_v59 }
 0x2a9   : > { %v2734_v12 = vpop.eup %2049  ;;  %2061 = vpow2.f32 %v968_v10  ;;  %v892_v10 = vsub.f32 %v2558_v14, %v2664_v56 }
 0x2aa   : > { %v2736_v32 = vpop.eup %2051  ;;  %v823_v43 = vpop.xlane.xlu0 %822  ;;  %v1073_v6 = vadd.f32 %v2734_v12, %v2732_v0  ;;  %v964_v54 = vmul.f32 1.442695, %v889_v57 }
 0x2ab   : > { %v2739_v36 = vpop.eup %2053  ;;  %v904_v14 = vsub.f32 %v2604_v37, %v823_v43 }
 0x2ac   : > { %v1082_v35 = vadd.f32 %v2739_v36, %v2736_v32 }
 0x2b0   : > { %1077 = vadd.xlane.f32.xlu0 %v1076_v55  ;;  %834 = vmax.xlane.f32.xlu2 %v833_v58  ;;  %v2752_v55 = vpop.eup %2055 }
 0x2b2   : > { %v826_v41 = vpop.xlane.xlu2 %825 }
 0x2b3   : > { %v906_v47 = vsub.f32 %v2612_v45, %v826_v41  ;;  %v907_v62 = vsub.f32 %v2614_v46, %v826_v41  ;;  %v2754_v45 = vpop.eup %2057  ;;  %v976_v46 = vmul.f32 1.442695, %v895_v9  ;;  %v893_v41 = vsub.f32 %v2560_v15, %v2664_v56 }
 0x2b4   : > { %v2756_v3 = vpop.eup %2059  ;;  %v1079_v11 = vadd.f32 %v2754_v45, %v2752_v55  ;;  %v970_v15 = vmul.f32 1.442695, %v892_v10  ;;  %v905_v56 = vsub.f32 %v2606_v38, %v823_v43  ;;  %v903_v38 = vsub.f32 %v2598_v34, %v2714_v42 }
 0x2b5   : > { %v998_v40 = vmul.f32 1.442695, %v906_v47  ;;  %v1000_v7 = vmul.f32 1.442695, %v907_v62  ;;  %v2758_v19 = vpop.eup %2061 }
 0x2b6   : > { %v1088_v62 = vadd.f32 %v2758_v19, %v2756_v3  ;;  %v996_v43 = vmul.f32 1.442695, %v905_v56 }
 0x2b7   : > { %2063 = vpow2.f32 %v998_v40 }
 0x2b8   : > { %1083 = vadd.xlane.f32.xlu0 %v1082_v35  ;;  %1074 = vadd.xlane.f32.xlu2 %v1073_v6  ;;  %2065 = vpow2.f32 %v1000_v7  ;;  %v972_v7 = vmul.f32 1.442695, %v893_v41 }
 0x2b9   : > { %2067 = vpow2.f32 %v962_v31 }
 0x2ba   : > { %2069 = vpow2.f32 %v964_v54  ;;  %v829_v58 = vpop.xlane.xlu0 %828  ;;  %v899_v54 = vsub.f32 %v2584_v27, %v2700_v49 }
 0x2bb   : > { %2071 = vpow2.f32 %v974_v20  ;;  %v908_v22 = vsub.f32 %v2618_v50, %v829_v58  ;;  %v909_v59 = vsub.f32 %v2620_v51, %v829_v58  ;;  %v896_v50 = vsub.f32 %v2578_v24, %v2692_v2  ;;  %v2792_v58 = vpop.f32.mrf.mxu2 }
 0x2bc   : > { %2073 = vpow2.f32 %v976_v46  ;;  %v898_v24 = vsub.f32 %v2582_v26, %v2700_v49  ;;  %v902_v20 = vsub.f32 %v2596_v33, %v2714_v42  ;;  %v994_v46 = vmul.f32 1.442695, %v904_v14 }
 0x2bd   : > { %v2064_v57 = vpop.eup %2063  ;;  %v1002_v44 = vmul.f32 1.442695, %v908_v22  ;;  %v1004_v47 = vmul.f32 1.442695, %v909_v59  ;;  %v978_v37 = vmul.f32 1.442695, %v896_v50  ;;  %v2794_v22 = vpop.f32.mrf.mxu3  ;;  %v897_v59 = vsub.f32 %v2576_v23, %v2692_v2 }
 0x2be   : > { %v2066_v9 = vpop.eup %2065  ;;  %v982_v27 = vmul.f32 1.442695, %v898_v24  ;;  %v984_v10 = vmul.f32 1.442695, %v899_v54  ;;  %v900_v42 = vsub.f32 %v2588_v29, %v2722_v17  ;;  %v901_v23 = vsub.f32 %v2590_v30, %v2722_v17 }
 0x2bf   : > { %v2772_v51 = vpop.eup %2067  ;;  %2075 = vpow2.f32 %v1002_v44  ;;  %v2775_v6 = vadd.f32 %v2066_v9, %v2064_v57  ;;  %v992_v2 = vmul.f32 1.442695, %v903_v38  ;;  %v980_v41 = vmul.f32 1.442695, %v897_v59 }
 0x2c0   : > { %1089 = vadd.xlane.f32.xlu0 %v1088_v62  ;;  %1080 = vadd.xlane.f32.xlu2 %v1079_v11  ;;  %v2777_v31 = vpop.eup %2069  ;;  %2077 = vpow2.f32 %v1004_v47  ;;  %v990_v11 = vmul.f32 1.442695, %v902_v20  ;;  %v986_v62 = vmul.f32 1.442695, %v900_v42  ;;  %v860_v29 = vmax.f32 %v2792_v58, %v2794_v22 }
 0x2c1   : > { %v2780_v40 = vpop.eup %2071  ;;  %2079 = vpow2.f32 %v970_v15  ;;  %v1085_v34 = vadd.f32 %v2777_v31, %v2772_v51  ;;  %v988_v14 = vmul.f32 1.442695, %v901_v23 }
 0x2c2   : > { %v2784_v35 = vpop.eup %2073  ;;  %2081 = vpow2.f32 %v972_v7 }
 0x2c3   : > { %v1094_v33 = vadd.f32 %v2784_v35, %v2780_v40  ;;  %2083 = vpow2.f32 %v978_v37  ;;  %v2814_v56 = vpop.f32.mrf.mxu2 }
 0x2c4   : > { %2085 = vpow2.f32 %v994_v46 }
 0x2c5   : > { %v2796_v26 = vpop.eup %2075  ;;  %2087 = vpow2.f32 %v996_v43  ;;  %v2816_v7 = vpop.f32.mrf.mxu3 }
 0x2c6   : > { %v2802_v49 = vpop.eup %2077  ;;  %1170 = vmatpush.xpose.msra.mxu0 %v2796_v26  ;;  %2089 = vpow2.f32 %v982_v27 }
 0x2c7   : > { %1193 = vmatpush.xpose.msrb.mxu1 %v2802_v49  ;;  %v2080_v44 = vpop.eup %2079  ;;  %2091 = vpow2.f32 %v984_v10  ;;  %v863_v10 = vmax.f32 %v2814_v56, %v2816_v7 }
 0x2c8   : > { %1095 = vadd.xlane.f32.xlu0 %v1094_v33  ;;  %1086 = vadd.xlane.f32.xlu2 %v1085_v34  ;;  %v2082_v47 = vpop.eup %2081  ;;  %2093 = vpow2.f32 %v990_v11 }
 0x2c9   : > { %v2084_v50 = vpop.eup %2083  ;;  %2095 = vpow2.f32 %v992_v2  ;;  %v1091_v17 = vadd.f32 %v2082_v47, %v2080_v44 }
 0x2ca   : > { %1171 = vmatpush.xpose.msra.mxu0 %v2064_v57  ;;  %v2086_v15 = vpop.eup %2085  ;;  %2097 = vpow2.f32 %v980_v41 }
 0x2cb   : > { %1194 = vmatpush.xpose.msrb.mxu1 %v2066_v9  ;;  %v2088_v30 = vpop.eup %2087  ;;  %2099 = vpow2.f32 %v986_v62  ;;  %v2818_v59 = vpop.f32.mrf.mxu2 }
 0x2cc   : > { %v2090_v57 = vpop.eup %2089  ;;  %2101 = vpow2.f32 %v988_v14 }
 0x2cd   : > { %v2092_v9 = vpop.eup %2091  ;;  %v2820_v27 = vpop.f32.mrf.mxu3 }
 0x2ce   : > { %1172 = vmatpush.xpose.msra.mxu0 %v2086_v15  ;;  %v2094_v24 = vpop.eup %2093  ;;  %v1100_v46 = vadd.f32 %v2092_v9, %v2090_v57  ;;  %v866_v33 = vmax.f32 %v2818_v59, %v2820_v27 }
 0x2cf   : > { %1195 = vmatpush.xpose.msrb.mxu1 %v2088_v30  ;;  %v2096_v37 = vpop.eup %2095 }
 0x2d0   : > { %861 = vmax.xlane.f32.xlu0 %v860_v29  ;;  %1092 = vadd.xlane.f32.xlu2 %v1091_v17  ;;  %v2098_v54 = vpop.eup %2097  ;;  %v1106_v11 = vadd.f32 %v2096_v37, %v2094_v24 }
 0x2d1   : > { %v2100_v20 = vpop.eup %2099  ;;  %v1097_v43 = vadd.f32 %v2098_v54, %v2084_v50 }
 0x2d2   : > { %1173 = vmatpush.xpose.msra.mxu0 %v2094_v24  ;;  %v2102_v38 = vpop.eup %2101 }
 0x2d3   : > { %1196 = vmatpush.xpose.msrb.mxu1 %v2096_v37  ;;  %v2828_v34 = vpop.f32.mrf.mxu2  ;;  %v1103_v23 = vadd.f32 %v2102_v38, %v2100_v20 }
 0x2d5   : > { %v2830_v42 = vpop.f32.mrf.mxu3 }
 0x2d6   : > { %1174 = vmatpush.xpose.msra.mxu0 %v2100_v20  ;;  %v869_v2 = vmax.f32 %v2828_v34, %v2830_v42 }
 0x2d7   : > { %1197 = vmatpush.xpose.msrb.mxu1 %v2102_v38 }
 0x2d8   : > { %1101 = vadd.xlane.f32.xlu0 %v1100_v46  ;;  %1098 = vadd.xlane.f32.xlu2 %v1097_v43 }
 0x2da   : > { %1175 = vmatpush.xpose.msra.mxu0 %v2090_v57 }
 0x2db   : > { %1198 = vmatpush.xpose.msrb.mxu1 %v2092_v9 }
 0x2dd   : > { %v2839_v41 = vpop.f32.mrf.mxu3 }
 0x2de   : > { %1176 = vmatpush.xpose.msra.mxu0 %v2084_v50 }
 0x2df   : > { %1199 = vmatpush.xpose.msrb.mxu1 %v2098_v54 }
 0x2e0   : > { %867 = vmax.xlane.f32.xlu0 %v866_v33  ;;  %864 = vmax.xlane.f32.xlu2 %v863_v10 }
 0x2e2   : > { %1177 = vmatpush.xpose.msra.mxu0 %v2780_v40  ;;  %v1109_v40 = vadd.f32 %v2088_v30, %v2086_v15 }
 0x2e3   : > { %1200 = vmatpush.xpose.msrb.mxu1 %v2784_v35  ;;  %v2837_v35 = vpop.f32.mrf.mxu2 }
 0x2e6   : > { %1178 = vmatpush.xpose.msra.mxu0 %v2080_v44 }
 0x2e7   : > { %1201 = vmatpush.xpose.msrb.mxu1 %v2082_v47 }
 0x2e8   : > { %1107 = vadd.xlane.f32.xlu0 %v1106_v11  ;;  %1104 = vadd.xlane.f32.xlu2 %v1103_v23 }
 0x2ea   : > { %1179 = vmatpush.xpose.msra.mxu0 %v2756_v3  ;;  %v872_v3 = vmax.f32 %v2837_v35, %v2839_v41 }
 0x2eb   : > { %1202 = vmatpush.xpose.msrb.mxu1 %v2758_v19  ;;  %v1115_v19 = vadd.f32 %v2802_v49, %v2796_v26  ;;  %v3645_v26 = vld [vmem:[#allocation17_spill] sm:$0xff] }
 0x2ee   : > { %1180 = vmatpush.xpose.msra.mxu0 %v2772_v51  ;;  %v2850_v51 = vpop.f32.mrf.mxu2 }
 0x2ef   : > { %1203 = vmatpush.xpose.msrb.mxu1 %v2777_v31  ;;  %v2852_v31 = vpop.f32.mrf.mxu3 }
 0x2f0   : > { %870 = vmax.xlane.f32.xlu0 %v869_v2  ;;  %1110 = vadd.xlane.f32.xlu2 %v1109_v40  ;;  %v3647_v2 = vld [vmem:[#allocation22_spill] sm:$0xff] }
 0x2f2   : > { %1181 = vmatpush.xpose.msra.mxu0 %v2736_v32 }
 0x2f3   : > { %1204 = vmatpush.xpose.msrb.mxu1 %v2739_v36  ;;  %v875_v36 = vmax.f32 %v2850_v51, %v2852_v31 }
 0x2f6   : > { %1182 = vmatpush.xpose.msra.mxu0 %v2752_v55 }
 0x2f7   : > { %1205 = vmatpush.xpose.msrb.mxu1 %v2754_v45 }
 0x2f8   : > { %873 = vmax.xlane.f32.xlu0 %v872_v3  ;;  %1116 = vadd.xlane.f32.xlu2 %v1115_v19 }
 0x2fa   : > { %1183 = vmatpush.xpose.msra.mxu0 %v2716_v48 }
 0x2fb   : > { %v2855_v32 = vpop.xlane.xlu0 %852  ;;  %1206 = vmatpush.xpose.msrb.mxu1 %v2719_v63 }
 0x2fe   : > { %1184 = vmatpush.xpose.msra.mxu0 %v2732_v0  ;;  %v3644_v0 = vld [vmem:[#allocation19_spill] sm:$0xff] }
 0x2ff   : > { %1207 = vmatpush.xpose.msrb.mxu1 %v2734_v12  ;;  %v2873_v12 = vadd.f32 %v3645_v26, %v3644_v0  ;;  %v3649_v26 = vld [vmem:[#allocation21_spill] sm:$0xff] }
 0x300   : > { %876 = vmax.xlane.f32.xlu0 %v875_v36 }
 0x302   : > { %1185 = vmatpush.xpose.msra.mxu0 %v2702_v1  ;;  %v3646_v1 = vld [vmem:[#allocation18_spill] sm:$0xff] }
 0x303   : > { %v2863_v55 = vpop.xlane.xlu0 %846  ;;  %v2865_v45 = vpop.xlane.xlu2 %855  ;;  %1208 = vmatpush.xpose.msrb.mxu1 %v2705_v4  ;;  %v2877_v49 = vadd.f32 %v3646_v1, %v3644_v0 }
 0x304   : > { %v921_v1 = vsub.f32 %v3649_v26, %v2863_v55 }
 0x305   : > { %1186 = vmatmul.f32.vlgmr.msra.gmra.mxu0 %v2514_v52 }
 0x306   : > { %1209 = vmatmul.f32.vlgmr.msrb.gmra.mxu1 %v2516_v53 }
 0x308   : > { %1113 = vadd.xlane.f32.xlu0 %v2775_v6 }
 0x30b   : > { %v841_v48 = vpop.xlane.xlu0 %840  ;;  %v850_v63 = vpop.xlane.xlu2 %849 }
 0x30c   : > { %v916_v46 = vsub.f32 %v2644_v18, %v841_v48  ;;  %v917_v43 = vsub.f32 %v2646_v21, %v841_v48  ;;  %v922_v33 = vsub.f32 %v2658_v39, %v850_v63  ;;  %v923_v40 = vsub.f32 %v3647_v2, %v850_v63  ;;  %v3648_v48 = vld [vmem:[#allocation20_spill] sm:$0xff] }
 0x30d   : > { %1189 = vmatmul.f32.gmra.mxu0 %v2873_v12  ;;  %v920_v63 = vsub.f32 %v3648_v48, %v2863_v55 }
 0x30e   : > { %1212 = vmatmul.f32.gmra.mxu1 %v2877_v49  ;;  %v1018_v3 = vmul.f32 1.442695, %v916_v46  ;;  %v1030_v18 = vmul.f32 1.442695, %v922_v33  ;;  %v1032_v21 = vmul.f32 1.442695, %v923_v40 }
 0x313   : > { %v832_v4 = vpop.xlane.xlu0 %831  ;;  %v844_v44 = vpop.xlane.xlu2 %843 }
 0x314   : > { %v910_v47 = vsub.f32 %v2626_v60, %v832_v4  ;;  %v911_v6 = vsub.f32 %v2628_v61, %v832_v4  ;;  %v918_v57 = vsub.f32 %v2648_v25, %v844_v44  ;;  %v919_v61 = vsub.f32 %v2650_v28, %v844_v44  ;;  %v3650_v44 = vld [vmem:[#allocation25_spill] sm:$0xff] }
 0x316   : > { %v1006_v62 = vmul.f32 1.442695, %v910_v47  ;;  %v1008_v29 = vmul.f32 1.442695, %v911_v6  ;;  %v1022_v54 = vmul.f32 1.442695, %v918_v57  ;;  %v926_v47 = vsub.f32 %v3650_v44, %v2865_v45 }
 0x318   : > { %2103 = vpow2.f32 %v1006_v62  ;;  %v3651_v62 = vld [vmem:[#allocation26_spill] sm:$0xff] }
 0x319   : > { %2105 = vpow2.f32 %v1008_v29  ;;  %v927_v29 = vsub.f32 %v3651_v62, %v2865_v45 }
 0x31b   : > { %v2883_v50 = vpop.xlane.xlu0 %1071  ;;  %v838_v14 = vpop.xlane.xlu2 %837 }
 0x31c   : > { %v914_v15 = vsub.f32 %v2640_v13, %v838_v14  ;;  %v915_v30 = vsub.f32 %v2642_v16, %v838_v14  ;;  %v1024_v13 = vmul.f32 1.442695, %v919_v61  ;;  %v1026_v14 = vmul.f32 1.442695, %v920_v63  ;;  %v3655_v63 = vld [vmem:[#allocation28_spill] sm:$0xff] }
 0x31d   : > { %v1040_v61 = vmul.f32 1.442695, %v927_v29  ;;  %vm1267_vm3 = vweird.f32 %v2883_v50 }
 0x31e   : > { %v2887_v17 = vpop.eup %2103  ;;  %v1014_v9 = vmul.f32 1.442695, %v914_v15  ;;  %v1016_v24 = vmul.f32 1.442695, %v915_v30  ;;  %v1028_v30 = vmul.f32 1.442695, %v921_v1 }
 0x31f   : > { %v2890_v60 = vpop.eup %2105 }
 0x320   : > { %2107 = vpow2.f32 %v1014_v9  ;;  %v1118_v37 = vadd.f32 %v2890_v60, %v2887_v17  ;;  %v1038_v9 = vmul.f32 1.442695, %v926_v47 }
 0x321   : > { %2109 = vpow2.f32 %v1016_v24 }
 0x322   : > { %1119 = vadd.xlane.f32.xlu0 %v1118_v37  ;;  %2111 = vpow2.f32 %v1022_v54 }
 0x323   : > { %v2895_v20 = vpop.xlane.xlu0 %1077  ;;  %v835_v16 = vpop.xlane.xlu2 %834  ;;  %2113 = vpow2.f32 %v1024_v13 }
 0x324   : > { %v912_v25 = vsub.f32 %v2632_v5, %v835_v16  ;;  %v913_v38 = vsub.f32 %v2634_v8, %v835_v16  ;;  %v1020_v8 = vmul.f32 1.442695, %v917_v43  ;;  %v3652_v16 = vld [vmem:[#allocation23_spill] sm:$0xff]  ;;  %vm1295_vm15 = vweird.f32 %v2895_v20 }
 0x325   : > { %v924_v46 = vsub.f32 %v3652_v16, %v2855_v32 }
 0x326   : > { %v2901_v28 = vpop.eup %2107  ;;  %v1010_v10 = vmul.f32 1.442695, %v912_v25  ;;  %v1012_v11 = vmul.f32 1.442695, %v913_v38  ;;  %v3653_v25 = vld [vmem:[#allocation24_spill] sm:$0xff] }
 0x327   : > { %v2904_v23 = vpop.eup %2109  ;;  %v925_v38 = vsub.f32 %v3653_v25, %v2855_v32 }
 0x328   : > { %2115 = vpow2.f32 %v1010_v10  ;;  %v1124_v5 = vadd.f32 %v2904_v23, %v2901_v28  ;;  %v2913_v36 = vpop.eup %2111 }
 0x329   : > { %2117 = vpow2.f32 %v1012_v11  ;;  %v2917_v0 = vpop.eup %2113  ;;  %v1034_v11 = vmul.f32 1.442695, %v924_v46  ;;  %v1036_v40 = vmul.f32 1.442695, %v925_v38 }
 0x32a   : > { %1125 = vadd.xlane.f32.xlu0 %v1124_v5  ;;  %2119 = vpow2.f32 %v1018_v3  ;;  %v1130_v55 = vadd.f32 %v2917_v0, %v2913_v36  ;;  %v859_v3 = vpop.xlane.xlu1 %858 }
 0x32b   : > { %v2909_v19 = vpop.xlane.xlu0 %1083  ;;  %v2911_v39 = vpop.xlane.xlu2 %1074  ;;  %2121 = vpow2.f32 %v1020_v8  ;;  %v929_v26 = vsub.f32 %v3655_v63, %v859_v3 }
 0x32c   : > { %2123 = vpow2.f32 %v1030_v18  ;;  %vm1281_vm8 = vweird.f32 %v2911_v39 }
 0x32d   : > { %2125 = vpow2.f32 %v1032_v21  ;;  %v3654_v21 = vld [vmem:[#allocation27_spill] sm:$0xff]  ;;  %v1044_v62 = vmul.f32 1.442695, %v929_v26 }
 0x32e   : > { %v2921_v4 = vpop.eup %2115  ;;  %2127 = vpow2.f32 %v1026_v14  ;;  %v928_v48 = vsub.f32 %v3654_v21, %v859_v3 }
 0x32f   : > { %v2925_v6 = vpop.eup %2117  ;;  %2129 = vpow2.f32 %v1028_v30 }
 0x330   : > { %v1121_v15 = vadd.f32 %v2925_v6, %v2921_v4  ;;  %v2933_v57 = vpop.eup %2119  ;;  %2131 = vpow2.f32 %v1038_v9  ;;  %v1042_v47 = vmul.f32 1.442695, %v928_v48 }
 0x331   : > { %v2935_v24 = vpop.eup %2121  ;;  %2133 = vpow2.f32 %v1040_v61 }
 0x332   : > { %1122 = vadd.xlane.f32.xlu2 %v1121_v15  ;;  %1131 = vadd.xlane.f32.xlu0 %v1130_v55  ;;  %v2941_v54 = vpop.eup %2123  ;;  %v1127_v43 = vadd.f32 %v2935_v24, %v2933_v57  ;;  %2135 = vpow2.f32 %v1034_v11 }
 0x333   : > { %v2937_v37 = vpop.xlane.xlu0 %1089  ;;  %v2939_v45 = vpop.xlane.xlu2 %1080  ;;  %2137 = vpow2.f32 %v1036_v40 }
 0x334   : > { %v2943_v13 = vpop.eup %2125  ;;  %2139 = vpow2.f32 %v1042_v47 }
 0x335   : > { %v1136_v33 = vadd.f32 %v2943_v13, %v2941_v54  ;;  %v2953_v10 = vpop.eup %2127  ;;  %2141 = vpow2.f32 %v1044_v62 }
 0x336   : > { %v2955_v2 = vpop.eup %2129 }
 0x337   : > { %v2959_v8 = vpop.eup %2131  ;;  %v1133_v1 = vadd.f32 %v2955_v2, %v2953_v10 }
 0x338   : > { %v2963_v18 = vpop.eup %2133 }
 0x339   : > { %v1142_v44 = vadd.f32 %v2963_v18, %v2959_v8  ;;  %v2971_v14 = vpop.eup %2135 }
 0x33a   : > { %1128 = vadd.xlane.f32.xlu2 %v1127_v43  ;;  %1137 = vadd.xlane.f32.xlu0 %v1136_v33  ;;  %v2977_v9 = vpop.eup %2137 }
 0x33b   : > { %v2957_v5 = vpop.xlane.xlu0 %1095  ;;  %v2961_v32 = vpop.xlane.xlu2 %1086  ;;  %v1139_v46 = vadd.f32 %v2977_v9, %v2971_v14 }
 0x33c   : > { %v2983_v38 = vpop.eup %2139 }
 0x342   : > { %1134 = vadd.xlane.f32.xlu2 %v1133_v1  ;;  %1143 = vadd.xlane.f32.xlu0 %v1142_v44 }
 0x343   : > { %v862_v29 = vpop.xlane.xlu0 %861  ;;  %v2973_v15 = vpop.xlane.xlu2 %1092 }
 0x344   : > { %v930_v55 = vsub.f32 %v2792_v58, %v862_v29  ;;  %v931_v30 = vsub.f32 %v2794_v22, %v862_v29  ;;  %v2987_v58 = vpop.eup %2141 }
 0x345   : > { %v1145_v40 = vadd.f32 %v2987_v58, %v2983_v38 }
 0x346   : > { %v1046_v61 = vmul.f32 1.442695, %v930_v55  ;;  %v1048_v16 = vmul.f32 1.442695, %v931_v30 }
 0x348   : > { %2143 = vpow2.f32 %v1046_v61 }
 0x349   : > { %2145 = vpow2.f32 %v1048_v16 }
 0x34a   : > { %1140 = vadd.xlane.f32.xlu2 %v1139_v46 }
 0x34b   : > { %v2981_v25 = vpop.xlane.xlu0 %1101  ;;  %v2985_v43 = vpop.xlane.xlu2 %1098 }
 0x34e   : > { %v2989_v22 = vpop.eup %2143 }
 0x34f   : > { %v2991_v33 = vpop.eup %2145 }
 0x350   : > { %v1148_v11 = vadd.f32 %v2991_v33, %v2989_v22 }
 0x352   : > { %1149 = vadd.xlane.f32.xlu0 %v1148_v11  ;;  %1146 = vadd.xlane.f32.xlu2 %v1145_v40 }
 0x353   : > { %v868_v3 = vpop.xlane.xlu0 %867  ;;  %v865_v21 = vpop.xlane.xlu2 %864 }
 0x354   : > { %v934_v48 = vsub.f32 %v2818_v59, %v868_v3  ;;  %v935_v63 = vsub.f32 %v2820_v27, %v868_v3  ;;  %v932_v26 = vsub.f32 %v2814_v56, %v865_v21  ;;  %v933_v1 = vsub.f32 %v2816_v7, %v865_v21 }
 0x356   : > { %v1054_v44 = vmul.f32 1.442695, %v934_v48  ;;  %v1050_v47 = vmul.f32 1.442695, %v932_v26  ;;  %v1052_v62 = vmul.f32 1.442695, %v933_v1 }
 0x357   : > { %v1056_v29 = vmul.f32 1.442695, %v935_v63 }
 0x358   : > { %2147 = vpow2.f32 %v1054_v44 }
 0x359   : > { %2149 = vpow2.f32 %v1050_v47 }
 0x35a   : > { %2151 = vpow2.f32 %v1052_v62 }
 0x35b   : > { %2153 = vpow2.f32 %v1056_v29  ;;  %v3001_v55 = vpop.xlane.xlu0 %1107 }
 0x35e   : > { %v2148_v30 = vpop.eup %2147 }
 0x35f   : > { %v2150_v61 = vpop.eup %2149 }
 0x360   : > { %v2152_v16 = vpop.eup %2151 }
 0x361   : > { %v2154_v59 = vpop.eup %2153  ;;  %v1151_v46 = vadd.f32 %v2152_v16, %v2150_v61 }
 0x362   : > { %v1154_v27 = vadd.f32 %v2154_v59, %v2148_v30 }
 0x363   : > { %1152 = vadd.xlane.f32.xlu2 %v1151_v46  ;;  %v871_v56 = vpop.xlane.xlu0 %870 }
 0x364   : > { %1155 = vadd.xlane.f32.xlu0 %v1154_v27  ;;  %v936_v7 = vsub.f32 %v2828_v34, %v871_v56  ;;  %v937_v11 = vsub.f32 %v2830_v42, %v871_v56 }
 0x366   : > { %v1058_v40 = vmul.f32 1.442695, %v936_v7  ;;  %v1060_v3 = vmul.f32 1.442695, %v937_v11 }
 0x368   : > { %2155 = vpow2.f32 %v1058_v40 }
 0x369   : > { %2157 = vpow2.f32 %v1060_v3 }
 0x36b   : > { %v874_v21 = vpop.xlane.xlu0 %873 }
 0x36c   : > { %v938_v48 = vsub.f32 %v2837_v35, %v874_v21  ;;  %v939_v63 = vsub.f32 %v2839_v41, %v874_v21 }
 0x36e   : > { %v2156_v26 = vpop.eup %2155  ;;  %v1062_v1 = vmul.f32 1.442695, %v938_v48  ;;  %v1064_v44 = vmul.f32 1.442695, %v939_v63 }
 0x36f   : > { %v2158_v47 = vpop.eup %2157 }
 0x370   : > { %2159 = vpow2.f32 %v1062_v1  ;;  %v1157_v62 = vadd.f32 %v2158_v47, %v2156_v26 }
 0x371   : > { %2161 = vpow2.f32 %v1064_v44  ;;  %v1273_v44 = vand.u32 2147483648, %v2883_v50 }
 0x372   : > { %1158 = vadd.xlane.f32.xlu2 %v1157_v62 }
 0x373   : > { %v877_v34 = vpop.xlane.xlu0 %876 }
 0x374   : > { %v940_v42 = vsub.f32 %v2850_v51, %v877_v34  ;;  %v941_v29 = vsub.f32 %v2852_v31, %v877_v34  ;;  %v3010_v51 = vpop.xlane.xlu2 %1104 }
 0x376   : > { %v2160_v46 = vpop.eup %2159  ;;  %v1066_v27 = vmul.f32 1.442695, %v940_v42  ;;  %v1068_v56 = vmul.f32 1.442695, %v941_v29  ;;  %v1274_v29 = vor.u32 1.1754944e-38, %v1273_v44 }
 0x377   : > { %v2162_v7 = vpop.eup %2161 }
 0x378   : > { %2163 = vpow2.f32 %v1066_v27  ;;  %v1160_v35 = vadd.f32 %v2162_v7, %v2160_v46 }
 0x379   : > { %2165 = vpow2.f32 %v1068_v56 }
 0x37a   : > { %1161 = vadd.xlane.f32.xlu0 %v1160_v35  ;;  %2167 = vrcp.f32 %v2883_v50 }
 0x37b   : > { %v3012_v3 = vpop.xlane.xlu0 %1113  ;;  %2169 = vrcp.f32 %v2911_v39 }
 0x37c   : > { %v3016_v63 = vpop.xlane.xlu2 %1110  ;;  %2171 = vrcp.f32 %v2895_v20 }
 0x37e   : > { %v2164_v41 = vpop.eup %2163 }
 0x37f   : > { %v2166_v11 = vpop.eup %2165  ;;  %1216 = vmatpush.xpose.msrb.mxu0 %v2164_v41 }
 0x380   : > { %1239 = vmatpush.xpose.msra.mxu1 %v2166_v11  ;;  %v1163_v40 = vadd.f32 %v2166_v11, %v2164_v41  ;;  %v2168_v31 = vpop.eup %2167 }
 0x381   : > { %v1263_v21 = vmul.f32 %v2168_v31, %v2883_v50  ;;  %vm1268_vm2 = vweird.f32 %v2168_v31 }
 0x382   : > { %1164 = vadd.xlane.f32.xlu2 %v1163_v40  ;;  %vm1269_vm4 = vmor %vm1267_vm3, %vm1268_vm2 }
 0x383   : > { %1217 = vmatpush.xpose.msrb.mxu0 %v2160_v46  ;;  %v1264_v48 = vsub.f32 1.0, %v1263_v21 }
 0x384   : > { %1240 = vmatpush.xpose.msra.mxu1 %v2162_v7 }
 0x387   : > { %1218 = vmatpush.xpose.msrb.mxu0 %v2156_v26  ;;  %v3019_v26 = vpop.eup %2169 }
 0x388   : > { %1241 = vmatpush.xpose.msra.mxu1 %v2158_v47  ;;  %v3032_v47 = vpop.xlane.xlu2 %1116  ;;  %vm1282_vm6 = vweird.f32 %v3019_v26 }
 0x389   : > { %vm3056_vm9 = vmor %vm1281_vm8, %vm1282_vm6 }
 0x38b   : > { %1219 = vmatpush.xpose.msrb.mxu0 %v2148_v30 }
 0x38c   : > { %1242 = vmatpush.xpose.msra.mxu1 %v2154_v59  ;;  %v1277_v59 = vmul.f32 %v3019_v26, %v2911_v39 }
 0x38e   : > { %v1278_v1 = vsub.f32 1.0, %v1277_v59 }
 0x38f   : > { %1220 = vmatpush.xpose.msrb.mxu0 %v2150_v61  ;;  %v1265_v61 = vmul.f32 %v2168_v31, %v1264_v48 }
 0x390   : > { %1243 = vmatpush.xpose.msra.mxu1 %v2152_v16  ;;  %v3027_v16 = vpop.eup %2171 }
 0x391   : > { %vm1296_vm14 = vweird.f32 %v3027_v16 }
 0x392   : > { %vm1297_vm0 = vmor %vm1295_vm15, %vm1296_vm14  ;;  %vm1323_vm14 = vweird.f32 %v2909_v19 }
 0x393   : > { %1221 = vmatpush.xpose.msrb.mxu0 %v2989_v22  ;;  %v1266_v22 = vadd.f32 %v2168_v31, %v1265_v61 }
 0x394   : > { %1244 = vmatpush.xpose.msra.mxu1 %v2991_v33 }
 0x395   : > { %v1120_v30 = vpop.xlane.xlu0 %1119 }
 0x396   : > { %2173 = vrcp.f32 %v1120_v30  ;;  %v1497_v35 = vand.u32 2147483648, %v1120_v30  ;;  %vm1491_vm10 = vweird.f32 %v1120_v30  ;;  %v1495_v40 = vand.u32 2147483647, %v1120_v30 }
 0x397   : > { %1222 = vmatpush.xpose.msrb.mxu0 %v2983_v38  ;;  %v1271_v38 = vand.u32 2147483647, %v2883_v50  ;;  %2175 = vrcp.f32 %v2939_v45 }
 0x398   : > { %1245 = vmatpush.xpose.msra.mxu1 %v2987_v58  ;;  %v1291_v58 = vmul.f32 %v3027_v16, %v2895_v20  ;;  %v1498_v59 = vor.u32 1.1754944e-38, %v1497_v35  ;;  %vm1496_vm13 = vcmp.eq.f32.partialorder %v1495_v40, 8.507059e+37 }
 0x399   : > { %vm1272_vm5 = vcmp.eq.f32.partialorder %v1271_v38, 8.507059e+37 }
 0x39a   : > { %v1292_v50 = vsub.f32 1.0, %v1291_v58  ;;  %v1299_v58 = vand.u32 2147483647, %v2895_v20 }
 0x39b   : > { %1223 = vmatpush.xpose.msrb.mxu0 %v2959_v8  ;;  %v1279_v8 = vmul.f32 %v3019_v26, %v1278_v1 }
 0x39c   : > { %v2174_v33 = vpop.eup %2173  ;;  %1246 = vmatpush.xpose.msra.mxu1 %v2963_v18  ;;  %v1270_v18 = vsel %vm1269_vm4, %v2168_v31, %v1266_v22  ;;  %vm1300_vm1 = vcmp.eq.f32.partialorder %v1299_v58, 8.507059e+37  ;;  %v1329_v58 = vand.u32 2147483648, %v2909_v19 }
 0x39d   : > { %v1487_v62 = vmul.f32 %v2174_v33, %v1120_v30  ;;  %v3041_v42 = vpop.xlane.xlu0 %1125  ;;  %v1275_v27 = vsel %vm1272_vm5, %v1274_v29, %v1270_v18  ;;  %v1280_v56 = vadd.f32 %v3019_v26, %v1279_v8  ;;  %vm1492_vm7 = vweird.f32 %v2174_v33  ;;  %v3048_v7 = vpop.eup %2175 }
 0x39e   : > { %2177 = vrcp.f32 %v3041_v42  ;;  %vm1493_vm11 = vmor %vm1491_vm10, %vm1492_vm7  ;;  %v1305_v31 = vmul.f32 %v3048_v7, %v2939_v45  ;;  %vm1310_vm3 = vweird.f32 %v3048_v7  ;;  %vm1309_vm5 = vweird.f32 %v2939_v45 }
 0x39f   : > { %v1488_v34 = vsub.f32 1.0, %v1487_v62  ;;  %1224 = vmatpush.xpose.msrb.mxu0 %v2971_v14  ;;  %2179 = vrcp.f32 %v2909_v19  ;;  %v1284_v21 = vsel %vm3056_vm9, %v3019_v26, %v1280_v56  ;;  %vm3118_vm8 = vmor %vm1309_vm5, %vm1310_vm3 }
 0x3a0   : > { %1247 = vmatpush.xpose.msra.mxu1 %v2977_v9  ;;  %v1287_v9 = vand.u32 2147483648, %v2911_v39  ;;  %v1306_v44 = vsub.f32 1.0, %v1305_v31 }
 0x3a1   : > { %v1489_v46 = vmul.f32 %v2174_v33, %v1488_v34 }
 0x3a3   : > { %1710 = vxpose.xlu0.b32.start [1/16] (narrow) %v1275_v27, 8  ;;  %1225 = vmatpush.xpose.msrb.mxu0 %v2941_v54  ;;  %v1490_v14 = vadd.f32 %v2174_v33, %v1489_v46  ;;  %v1285_v54 = vand.u32 2147483647, %v2911_v39  ;;  %v1288_v39 = vor.u32 1.1754944e-38, %v1287_v9 }
 0x3a4   : > { %1248 = vmatpush.xpose.msra.mxu1 %v2943_v13  ;;  %v1293_v13 = vmul.f32 %v3027_v16, %v1292_v50  ;;  %v3070_v30 = vpop.eup %2177 }
 0x3a5   : > { %v3054_v41 = vpop.xlane.xlu2 %1122  ;;  %v1494_v48 = vsel %vm1493_vm11, %v2174_v33, %v1490_v14  ;;  %vm1286_vm12 = vcmp.eq.f32.partialorder %v1285_v54, 8.507059e+37  ;;  %v3072_v22 = vpop.eup %2179  ;;  %v1301_v33 = vand.u32 2147483648, %v2895_v20  ;;  %vm1520_vm9 = vweird.f32 %v3070_v30 }
 0x3a6   : > { %2181 = vrcp.f32 %v3054_v41  ;;  %v1289_v61 = vsel %vm1286_vm12, %v1288_v39, %v1284_v21  ;;  %v1499_v1 = vsel %vm1496_vm13, %v1498_v59, %v1494_v48  ;;  %v1319_v8 = vmul.f32 %v3072_v22, %v2909_v19  ;;  %v3092_v29 = vpop.xlane.xlu0 %1131 }
 0x3a7   : > { %1226 = vmatpush.xpose.msrb.mxu0 %v2953_v10  ;;  %v1294_v10 = vadd.f32 %v3027_v16, %v1293_v13  ;;  %2183 = vrcp.f32 %v2961_v32  ;;  %v1302_v46 = vor.u32 1.1754944e-38, %v1301_v33  ;;  %v1511_v50 = vand.u32 2147483648, %v3054_v41 }
 0x3a8   : > { %1249 = vmatpush.xpose.msra.mxu1 %v2955_v2  ;;  %v1515_v2 = vmul.f32 %v3070_v30, %v3041_v42  ;;  %v1320_v27 = vsub.f32 1.0, %v1319_v8  ;;  %v1509_v14 = vand.u32 2147483647, %v3054_v41  ;;  %vm1505_vm4 = vweird.f32 %v3054_v41 }
 0x3a9   : > { %v1298_v34 = vsel %vm1297_vm0, %v3027_v16, %v1294_v10  ;;  %v1512_v40 = vor.u32 1.1754944e-38, %v1511_v50  ;;  %v1313_v13 = vand.u32 2147483647, %v2939_v45  ;;  %vm1519_vm11 = vweird.f32 %v3041_v42 }
 0x3aa   : > { %v1516_v18 = vsub.f32 1.0, %v1515_v2  ;;  %v1303_v56 = vsel %vm1300_vm1, %v1302_v46, %v1298_v34  ;;  %vm1510_vm7 = vcmp.eq.f32.partialorder %v1509_v14, 8.507059e+37  ;;  %v1523_v10 = vand.u32 2147483647, %v3041_v42  ;;  %vm3140_vm12 = vmor %vm1519_vm11, %vm1520_vm9 }
 0x3ab   : > { %1711 = vxpose.xlu0.b32.cont [2/16] (narrow) %v1289_v61, 8  ;;  %1742 = vxpose.xlu2.b32.start [1/16] (narrow) %v1499_v1, 8  ;;  %vm1314_vm10 = vcmp.eq.f32.partialorder %v1313_v13, 8.507059e+37  ;;  %vm1324_vm13 = vweird.f32 %v3072_v22  ;;  %v1330_v46 = vor.u32 1.1754944e-38, %v1329_v58  ;;  %vm1547_vm11 = vweird.f32 %v3092_v29 }
 0x3ac   : > { %v2182_v26 = vpop.eup %2181  ;;  %1227 = vmatpush.xpose.msrb.mxu0 %v2913_v36  ;;  %1250 = vmatpush.xpose.msra.mxu1 %v2917_v0  ;;  %v1307_v36 = vmul.f32 %v3048_v7, %v1306_v44  ;;  %v1517_v35 = vmul.f32 %v3070_v30, %v1516_v18  ;;  %v1525_v44 = vand.u32 2147483648, %v3041_v42  ;;  %vm1524_vm15 = vcmp.eq.f32.partialorder %v1523_v10, 8.507059e+37  ;;  %vm3160_vm0 = vmor %vm1323_vm14, %vm1324_vm13 }
 0x3ad   : > { %v1501_v62 = vmul.f32 %v2182_v26, %v3054_v41  ;;  %v3084_v38 = vpop.xlane.xlu2 %1128  ;;  %vm1506_vm2 = vweird.f32 %v2182_v26  ;;  %v3099_v16 = vpop.eup %2183  ;;  %v1315_v41 = vand.u32 2147483648, %v2939_v45  ;;  %vm1351_vm14 = vweird.f32 %v2937_v37 }
 0x3ae   : > { %2185 = vrcp.f32 %v3084_v38  ;;  %vm1507_vm6 = vmor %vm1505_vm4, %vm1506_vm2  ;;  %v1333_v31 = vmul.f32 %v3099_v16, %v2961_v32  ;;  %v1518_v61 = vadd.f32 %v3070_v30, %v1517_v35  ;;  %v1526_v8 = vor.u32 1.1754944e-38, %v1525_v44  ;;  %v3171_v18 = vpop.xlane.xlu0 %1137 }
 0x3af   : > { %v1502_v0 = vsub.f32 1.0, %v1501_v62  ;;  %2187 = vrcp.f32 %v3092_v29  ;;  %v1316_v59 = vor.u32 1.1754944e-38, %v1315_v41  ;;  %vm1533_vm3 = vweird.f32 %v3084_v38 }
 0x3b0   : > { %1228 = vmatpush.xpose.msrb.mxu0 %v2933_v57  ;;  %1251 = vmatpush.xpose.msra.mxu1 %v2935_v24  ;;  %v1308_v24 = vadd.f32 %v3048_v7, %v1307_v36  ;;  %2189 = vrcp.f32 %v2937_v37  ;;  %v1522_v42 = vsel %vm3140_vm12, %v3070_v30, %v1518_v61  ;;  %v1327_v36 = vand.u32 2147483647, %v2909_v19 }
 0x3b1   : > { %v1503_v20 = vmul.f32 %v2182_v26, %v1502_v0  ;;  %v1527_v34 = vsel %vm1524_vm15, %v1526_v8, %v1522_v42  ;;  %vm1338_vm5 = vweird.f32 %v3099_v16  ;;  %v1343_v41 = vand.u32 2147483648, %v2961_v32 }
 0x3b2   : > { %v1312_v48 = vsel %vm3118_vm8, %v3048_v7, %v1308_v24  ;;  %vm1328_vm2 = vcmp.eq.f32.partialorder %v1327_v36, 8.507059e+37 }
 0x3b3   : > { %1712 = vxpose.xlu0.b32.cont [3/16] (narrow) %v1303_v56, 8  ;;  %v1504_v57 = vadd.f32 %v2182_v26, %v1503_v20  ;;  %v1317_v7 = vsel %vm1314_vm10, %v1316_v59, %v1312_v48 }
 0x3b4   : > { %v3104_v9 = vpop.eup %2185  ;;  %1229 = vmatpush.xpose.msrb.mxu0 %v2901_v28  ;;  %1252 = vmatpush.xpose.msra.mxu1 %v2904_v23  ;;  %v1321_v23 = vmul.f32 %v3072_v22, %v1320_v27 }
 0x3b5   : > { %v1529_v11 = vmul.f32 %v3104_v9, %v3084_v38  ;;  %v1508_v54 = vsel %vm1507_vm6, %v2182_v26, %v1504_v57  ;;  %v3128_v39 = vpop.xlane.xlu2 %1134  ;;  %v3133_v1 = vpop.eup %2187  ;;  %v1334_v26 = vsub.f32 1.0, %v1333_v31  ;;  %vm1534_vm1 = vweird.f32 %v3104_v9 }
 0x3b6   : > { %v1513_v21 = vsel %vm1510_vm7, %v1512_v40, %v1508_v54  ;;  %2191 = vrcp.f32 %v3128_v39  ;;  %v1322_v2 = vadd.f32 %v3072_v22, %v1321_v23  ;;  %v1543_v33 = vmul.f32 %v3133_v1, %v3092_v29  ;;  %vm3182_vm4 = vmor %vm1533_vm3, %vm1534_vm1  ;;  %v3250_v0 = vpop.xlane.xlu0 %1143 }
 0x3b7   : > { %v1530_v45 = vsub.f32 1.0, %v1529_v11  ;;  %1743 = vxpose.xlu2.b32.cont [2/16] (narrow) %v1513_v21, 8  ;;  %2193 = vrcp.f32 %v2973_v15  ;;  %v1335_v30 = vmul.f32 %v3099_v16, %v1334_v26  ;;  %vm1337_vm6 = vweird.f32 %v2961_v32 }
 0x3b8   : > { %1230 = vmatpush.xpose.msrb.mxu0 %v2921_v4  ;;  %1253 = vmatpush.xpose.msra.mxu1 %v2925_v6  ;;  %v3146_v6 = vpop.eup %2189  ;;  %v1544_v19 = vsub.f32 1.0, %v1543_v33  ;;  %2195 = vrcp.f32 %v3171_v18  ;;  %v1341_v54 = vand.u32 2147483647, %v2961_v32  ;;  %vm3200_vm8 = vmor %vm1337_vm6, %vm1338_vm5  ;;  %v1344_v21 = vor.u32 1.1754944e-38, %v1343_v41 }
 0x3b9   : > { %v1531_v62 = vmul.f32 %v3104_v9, %v1530_v45  ;;  %v1336_v14 = vadd.f32 %v3099_v16, %v1335_v30  ;;  %2197 = vrcp.f32 %v2957_v5  ;;  %vm1548_vm9 = vweird.f32 %v3133_v1 }
 0x3ba   : > { %v1545_v24 = vmul.f32 %v3133_v1, %v1544_v19  ;;  %vm1342_vm10 = vcmp.eq.f32.partialorder %v1341_v54, 8.507059e+37  ;;  %vm3222_vm12 = vmor %vm1547_vm11, %vm1548_vm9  ;;  %vm1352_vm13 = vweird.f32 %v3146_v6  ;;  %v1357_v4 = vand.u32 2147483648, %v2937_v37 }
 0x3bb   : > { %1713 = vxpose.xlu0.b32.cont [4/16] (narrow) %v1317_v7, 8  ;;  %v1532_v20 = vadd.f32 %v3104_v9, %v1531_v62  ;;  %v1340_v23 = vsel %vm3200_vm8, %v3099_v16, %v1336_v14  ;;  %v1551_v16 = vand.u32 2147483647, %v3092_v29  ;;  %v1355_v33 = vand.u32 2147483647, %v2937_v37 }
 0x3bc   : > { %1231 = vmatpush.xpose.msrb.mxu0 %v2887_v17  ;;  %1254 = vmatpush.xpose.msra.mxu1 %v2890_v60  ;;  %v1347_v17 = vmul.f32 %v3146_v6, %v2937_v37  ;;  %v1326_v60 = vsel %vm3160_vm0, %v3072_v22, %v1322_v2  ;;  %v3176_v50 = vpop.eup %2191  ;;  %v1537_v22 = vand.u32 2147483647, %v3084_v38  ;;  %v1546_v48 = vadd.f32 %v3133_v1, %v1545_v24  ;;  %vm3240_vm0 = vmor %vm1351_vm14, %vm1352_vm13 }
 0x3bd   : > { %v1331_v27 = vsel %vm1328_vm2, %v1330_v46, %v1326_v60  ;;  %v3188_v57 = vpop.eup %2193  ;;  %v1557_v35 = vmul.f32 %v3176_v50, %v3128_v39  ;;  %v3211_v31 = vpop.xlane.xlu2 %1140  ;;  %v1345_v59 = vsel %vm1342_vm10, %v1344_v21, %v1340_v23  ;;  %vm1552_vm15 = vcmp.eq.f32.partialorder %v1551_v16, 8.507059e+37 }
 0x3be   : > { %v1348_v56 = vsub.f32 1.0, %v1347_v17  ;;  %vm1538_vm7 = vcmp.eq.f32.partialorder %v1537_v22, 8.507059e+37  ;;  %v1361_v28 = vmul.f32 %v3188_v57, %v2973_v15  ;;  %v3216_v45 = vpop.eup %2195  ;;  %2199 = vrcp.f32 %v3211_v31 }
 0x3bf   : > { %1232 = vmatmul.f32.vlgmr.msrb.gmra.mxu0 %v2514_v52  ;;  %1255 = vmatmul.f32.vlgmr.msra.gmra.mxu1 %v2516_v53  ;;  %v1539_v52 = vand.u32 2147483648, %v3084_v38  ;;  %v1536_v38 = vsel %vm3182_vm4, %v3104_v9, %v1532_v20  ;;  %v1558_v32 = vsub.f32 1.0, %v1557_v35  ;;  %v3228_v7 = vpop.eup %2197  ;;  %v1571_v10 = vmul.f32 %v3216_v45, %v3171_v18 }
 0x3c0   : > { %1744 = vxpose.xlu2.b32.cont [3/16] (narrow) %v1527_v34, 8  ;;  %v1349_v13 = vmul.f32 %v3146_v6, %v1348_v56  ;;  %v1362_v61 = vsub.f32 1.0, %v1361_v28  ;;  %2201 = vrcp.f32 %v2985_v43  ;;  %v1375_v42 = vmul.f32 %v3228_v7, %v2957_v5 }
 0x3c1   : > { %v1540_v11 = vor.u32 1.1754944e-38, %v1539_v52  ;;  %v1559_v26 = vmul.f32 %v3176_v50, %v1558_v32  ;;  %v1572_v36 = vsub.f32 1.0, %v1571_v10  ;;  %v1358_v37 = vor.u32 1.1754944e-38, %v1357_v4 }
 0x3c2   : > { %v1350_v44 = vadd.f32 %v3146_v6, %v1349_v13  ;;  %v1363_v58 = vmul.f32 %v3188_v57, %v1362_v61  ;;  %vm1562_vm1 = vweird.f32 %v3176_v50  ;;  %vm1356_vm2 = vcmp.eq.f32.partialorder %v1355_v33, 8.507059e+37 }
 0x3c3   : > { %1714 = vxpose.xlu0.b32.cont [5/16] (narrow) %v1331_v27, 8  ;;  %v1541_v9 = vsel %vm1538_vm7, %v1540_v11, %v1536_v38  ;;  %v1560_v17 = vadd.f32 %v3176_v50, %v1559_v26  ;;  %v1567_v34 = vand.u32 2147483648, %v3128_v39  ;;  %vm1561_vm3 = vweird.f32 %v3128_v39 }
 0x3c4   : > { %v1354_v8 = vsel %vm3240_vm0, %v3146_v6, %v1350_v44  ;;  %v3254_v30 = vpop.eup %2199  ;;  %v1565_v19 = vand.u32 2147483647, %v3128_v39  ;;  %v1376_v6 = vsub.f32 1.0, %v1375_v42  ;;  %2203 = vrcp.f32 %v3250_v0  ;;  %vm3260_vm4 = vmor %vm1561_vm3, %vm1562_vm1 }
 0x3c5   : > { %v1359_v60 = vsel %vm1356_vm2, %v1358_v37, %v1354_v8  ;;  %v1364_v20 = vadd.f32 %v3188_v57, %v1363_v58  ;;  %vm1366_vm5 = vweird.f32 %v3188_v57  ;;  %v1573_v27 = vmul.f32 %v3216_v45, %v1572_v36  ;;  %v3288_v54 = vpop.xlane.xlu2 %1146 }
 0x3c6   : > { %v3266_v52 = vpop.eup %2201  ;;  %v1585_v22 = vmul.f32 %v3254_v30, %v3211_v31  ;;  %v1564_v39 = vsel %vm3260_vm4, %v3176_v50, %v1560_v17  ;;  %v1371_v56 = vand.u32 2147483648, %v2973_v15  ;;  %vm1365_vm6 = vweird.f32 %v2973_v15 }
 0x3c7   : > { %1235 = vmatmul.f32.gmra.mxu0 %v2873_v12  ;;  %1258 = vmatmul.f32.gmra.mxu1 %v2877_v49  ;;  %v1553_v12 = vand.u32 2147483648, %v3092_v29  ;;  %v1550_v29 = vsel %vm3222_vm12, %v3133_v1, %v1546_v48  ;;  %v1568_v53 = vor.u32 1.1754944e-38, %v1567_v34  ;;  %v1369_v14 = vand.u32 2147483647, %v2973_v15  ;;  %vm3278_vm8 = vmor %vm1365_vm6, %vm1366_vm5 }
 0x3c8   : > { %1745 = vxpose.xlu2.b32.cont [4/16] (narrow) %v1541_v9, 8  ;;  %2205 = vrcp.f32 %v2981_v25  ;;  %vm1566_vm7 = vcmp.eq.f32.partialorder %v1565_v19, 8.507059e+37  ;;  %v1377_v35 = vmul.f32 %v3228_v7, %v1376_v6  ;;  %v1389_v38 = vmul.f32 %v3266_v52, %v2985_v43 }
 0x3c9   : > { %v1554_v2 = vor.u32 1.1754944e-38, %v1553_v12  ;;  %v1569_v50 = vsel %vm1566_vm7, %v1568_v53, %v1564_v39  ;;  %v1368_v41 = vsel %vm3278_vm8, %v3188_v57, %v1364_v20  ;;  %v1586_v11 = vsub.f32 1.0, %v1585_v22 }
 0x3ca   : > { %v1372_v15 = vor.u32 1.1754944e-38, %v1371_v56  ;;  %v1574_v40 = vadd.f32 %v3216_v45, %v1573_v27  ;;  %vm1576_vm9 = vweird.f32 %v3216_v45  ;;  %v3292_v13 = vpop.eup %2203  ;;  %vm1370_vm10 = vcmp.eq.f32.partialorder %v1369_v14, 8.507059e+37 }
 0x3cb   : > { %1715 = vxpose.xlu0.b32.cont [6/16] (narrow) %v1345_v59, 8  ;;  %v1555_v1 = vsel %vm1552_vm15, %v1554_v2, %v1550_v29  ;;  %v1581_v28 = vand.u32 2147483648, %v3171_v18  ;;  %vm1575_vm11 = vweird.f32 %v3171_v18  ;;  %v1579_v23 = vand.u32 2147483647, %v3171_v18  ;;  %v3326_v2 = vpop.xlane.xlu0 %1149 }
 0x3cc   : > { %v1373_v9 = vsel %vm1370_vm10, %v1372_v15, %v1368_v41  ;;  %v1390_v57 = vsub.f32 1.0, %v1389_v38  ;;  %2207 = vrcp.f32 %v3288_v54  ;;  %vm3298_vm12 = vmor %vm1575_vm11, %vm1576_vm9  ;;  %v1378_v21 = vadd.f32 %v3228_v7, %v1377_v35 }
 0x3cd   : > { %vm1380_vm13 = vweird.f32 %v3228_v7  ;;  %v1599_v12 = vmul.f32 %v3292_v13, %v3250_v0  ;;  %v1587_v59 = vmul.f32 %v3254_v30, %v1586_v11  ;;  %v1578_v18 = vsel %vm3298_vm12, %v3216_v45, %v1574_v40 }
 0x3ce   : > { %v3304_v48 = vpop.eup %2205  ;;  %v1385_v16 = vand.u32 2147483648, %v2957_v5  ;;  %vm1379_vm14 = vweird.f32 %v2957_v5  ;;  %v1582_v61 = vor.u32 1.1754944e-38, %v1581_v28  ;;  %v1383_v49 = vand.u32 2147483647, %v2957_v5 }
 0x3cf   : > { %2209 = vrcp.f32 %v3010_v51  ;;  %vm1580_vm15 = vcmp.eq.f32.partialorder %v1579_v23, 8.507059e+37  ;;  %vm3316_vm0 = vmor %vm1379_vm14, %vm1380_vm13  ;;  %v1391_v10 = vmul.f32 %v3266_v52, %v1390_v57  ;;  %v1403_v26 = vmul.f32 %v3304_v48, %v2981_v25 }
 0x3d0   : > { %1746 = vxpose.xlu2.b32.cont [5/16] (narrow) %v1555_v1, 8  ;;  %v1583_v45 = vsel %vm1580_vm15, %v1582_v61, %v1578_v18  ;;  %v1382_v29 = vsel %vm3316_vm0, %v3228_v7, %v1378_v21  ;;  %v1600_v4 = vsub.f32 1.0, %v1599_v12  ;;  %v1386_v5 = vor.u32 1.1754944e-38, %v1385_v16 }
 0x3d1   : > { %v1588_v33 = vadd.f32 %v3254_v30, %v1587_v59  ;;  %vm1590_vm1 = vweird.f32 %v3254_v30  ;;  %vm1384_vm2 = vcmp.eq.f32.partialorder %v1383_v49, 8.507059e+37  ;;  %v1595_v42 = vand.u32 2147483648, %v3211_v31 }
 0x3d2   : > { %v3330_v62 = vpop.eup %2207  ;;  %vm1589_vm3 = vweird.f32 %v3211_v31  ;;  %v1387_v58 = vsel %vm1384_vm2, %v1386_v5, %v1382_v29  ;;  %v1593_v1 = vand.u32 2147483647, %v3211_v31  ;;  %v1404_v7 = vsub.f32 1.0, %v1403_v26 }
 0x3d3   : > { %1716 = vxpose.xlu0.b32.cont [7/16] (narrow) %v1359_v60, 8  ;;  %2211 = vrcp.f32 %v3326_v2  ;;  %vm3336_vm4 = vmor %vm1589_vm3, %vm1590_vm1  ;;  %v1392_v36 = vadd.f32 %v3266_v52, %v1391_v10  ;;  %vm1394_vm5 = vweird.f32 %v3266_v52  ;;  %v1601_v17 = vmul.f32 %v3292_v13, %v1600_v4 }
 0x3d4   : > { %v1613_v34 = vmul.f32 %v3330_v62, %v3288_v54  ;;  %v1592_v31 = vsel %vm3336_vm4, %v3254_v30, %v1588_v33  ;;  %v1399_v60 = vand.u32 2147483648, %v2985_v43  ;;  %vm1393_vm6 = vweird.f32 %v2985_v43 }
 0x3d5   : > { %v3342_v37 = vpop.eup %2209  ;;  %v1596_v19 = vor.u32 1.1754944e-38, %v1595_v42  ;;  %v1397_v6 = vand.u32 2147483647, %v2985_v43  ;;  %2213 = vrcp.f32 %v3001_v55  ;;  %vm1594_vm7 = vcmp.eq.f32.partialorder %v1593_v1, 8.507059e+37  ;;  %vm3354_vm8 = vmor %vm1393_vm6, %vm1394_vm5 }
 0x3d6   : > { %v1405_v20 = vmul.f32 %v3304_v48, %v1404_v7  ;;  %v1417_v27 = vmul.f32 %v3342_v37, %v3010_v51  ;;  %v1396_v22 = vsel %vm3354_vm8, %v3266_v52, %v1392_v36  ;;  %v1614_v39 = vsub.f32 1.0, %v1613_v34  ;;  %v3364_v56 = vpop.xlane.xlu2 %1152 }
 0x3d7   : > { %v1597_v30 = vsel %vm1594_vm7, %v1596_v19, %v1592_v31  ;;  %v1400_v43 = vor.u32 1.1754944e-38, %v1399_v60  ;;  %v1602_v53 = vadd.f32 %v3292_v13, %v1601_v17  ;;  %vm1604_vm9 = vweird.f32 %v3292_v13  ;;  %v3402_v18 = vpop.xlane.xlu0 %1155 }
 0x3d8   : > { %1747 = vxpose.xlu2.b32.cont [6/16] (narrow) %v1569_v50, 8  ;;  %vm1398_vm10 = vcmp.eq.f32.partialorder %v1397_v6, 8.507059e+37  ;;  %v1609_v24 = vand.u32 2147483648, %v3250_v0  ;;  %vm1603_vm11 = vweird.f32 %v3250_v0  ;;  %v1607_v38 = vand.u32 2147483647, %v3250_v0 }
 0x3d9   : > { %v3368_v14 = vpop.eup %2211  ;;  %v1401_v35 = vsel %vm1398_vm10, %v1400_v43, %v1396_v22  ;;  %v1418_v52 = vsub.f32 1.0, %v1417_v27  ;;  %2215 = vrcp.f32 %v3364_v56  ;;  %vm3374_vm12 = vmor %vm1603_vm11, %vm1604_vm9  ;;  %v1406_v41 = vadd.f32 %v3304_v48, %v1405_v20 }
 0x3da   : > { %vm1408_vm13 = vweird.f32 %v3304_v48  ;;  %v1627_v15 = vmul.f32 %v3368_v14, %v3326_v2  ;;  %v1615_v40 = vmul.f32 %v3330_v62, %v1614_v39  ;;  %v1606_v0 = vsel %vm3374_vm12, %v3292_v13, %v1602_v53 }
 0x3db   : > { %1717 = vxpose.xlu0.b32.cont [8/16] (narrow) %v1373_v9, 8  ;;  %v3380_v11 = vpop.eup %2213  ;;  %v1413_v28 = vand.u32 2147483648, %v2981_v25  ;;  %vm1407_vm14 = vweird.f32 %v2981_v25  ;;  %v1610_v9 = vor.u32 1.1754944e-38, %v1609_v24  ;;  %v1411_v23 = vand.u32 2147483647, %v2981_v25 }
 0x3dc   : > { %2217 = vrcp.f32 %v3016_v63  ;;  %vm1608_vm15 = vcmp.eq.f32.partialorder %v1607_v38, 8.507059e+37  ;;  %vm3392_vm0 = vmor %vm1407_vm14, %vm1408_vm13  ;;  %v1419_v32 = vmul.f32 %v3342_v37, %v1418_v52  ;;  %v1431_v21 = vmul.f32 %v3380_v11, %v3001_v55 }
 0x3dd   : > { %v1611_v13 = vsel %vm1608_vm15, %v1610_v9, %v1606_v0  ;;  %v1410_v12 = vsel %vm3392_vm0, %v3304_v48, %v1406_v41  ;;  %v1628_v59 = vsub.f32 1.0, %v1627_v15  ;;  %v1414_v25 = vor.u32 1.1754944e-38, %v1413_v28 }
 0x3de   : > { %v1616_v16 = vadd.f32 %v3330_v62, %v1615_v40  ;;  %vm1618_vm1 = vweird.f32 %v3330_v62  ;;  %vm1412_vm2 = vcmp.eq.f32.partialorder %v1411_v23, 8.507059e+37  ;;  %v1623_v49 = vand.u32 2147483648, %v3288_v54 }
 0x3df   : > { %v3406_v61 = vpop.eup %2215  ;;  %vm1617_vm3 = vweird.f32 %v3288_v54  ;;  %v1415_v44 = vsel %vm1412_vm2, %v1414_v25, %v1410_v12  ;;  %v1621_v10 = vand.u32 2147483647, %v3288_v54  ;;  %v1432_v48 = vsub.f32 1.0, %v1431_v21 }
 0x3e0   : > { %1748 = vxpose.xlu2.b32.cont [7/16] (narrow) %v1583_v45, 8  ;;  %2219 = vrcp.f32 %v3402_v18  ;;  %vm3412_vm4 = vmor %vm1617_vm3, %vm1618_vm1  ;;  %v1420_v45 = vadd.f32 %v3342_v37, %v1419_v32  ;;  %vm1422_vm5 = vweird.f32 %v3342_v37  ;;  %v1629_v4 = vmul.f32 %v3368_v14, %v1628_v59 }
 0x3e1   : > { %v1641_v5 = vmul.f32 %v3406_v61, %v3364_v56  ;;  %v1620_v54 = vsel %vm3412_vm4, %v3330_v62, %v1616_v16  ;;  %v1427_v33 = vand.u32 2147483648, %v3010_v51  ;;  %vm1421_vm6 = vweird.f32 %v3010_v51 }
 0x3e2   : > { %v3418_v29 = vpop.eup %2217  ;;  %v1624_v42 = vor.u32 1.1754944e-38, %v1623_v49  ;;  %2221 = vrcp.f32 %v3012_v3  ;;  %vm1622_vm7 = vcmp.eq.f32.partialorder %v1621_v10, 8.507059e+37  ;;  %vm3430_vm8 = vmor %vm1421_vm6, %vm1422_vm5  ;;  %v1433_v7 = vmul.f32 %v3380_v11, %v1432_v48 }
 0x3e3   : > { %1718 = vxpose.xlu0.b32.cont [9/16] (narrow) %v1387_v58, 8  ;;  %v1425_v58 = vand.u32 2147483647, %v3010_v51  ;;  %v1445_v8 = vmul.f32 %v3418_v29, %v3016_v63  ;;  %v1424_v36 = vsel %vm3430_vm8, %v3342_v37, %v1420_v45  ;;  %v1642_v17 = vsub.f32 1.0, %v1641_v5 }
 0x3e4   : > { %v1625_v62 = vsel %vm1622_vm7, %v1624_v42, %v1620_v54  ;;  %v1428_v51 = vor.u32 1.1754944e-38, %v1427_v33  ;;  %v1630_v31 = vadd.f32 %v3368_v14, %v1629_v4  ;;  %vm1632_vm9 = vweird.f32 %v3368_v14 }
 0x3e5   : > { %v3440_v34 = vpop.xlane.xlu2 %1158  ;;  %vm1426_vm10 = vcmp.eq.f32.partialorder %v1425_v58, 8.507059e+37  ;;  %v1637_v19 = vand.u32 2147483648, %v3326_v2  ;;  %vm1631_vm11 = vweird.f32 %v3326_v2  ;;  %v1635_v46 = vand.u32 2147483647, %v3326_v2 }
 0x3e6   : > { %v3444_v60 = vpop.eup %2219  ;;  %v1429_v6 = vsel %vm1426_vm10, %v1428_v51, %v1424_v36  ;;  %v1446_v37 = vsub.f32 1.0, %v1445_v8  ;;  %2223 = vrcp.f32 %v3440_v34  ;;  %vm3450_vm12 = vmor %vm1631_vm11, %vm1632_vm9  ;;  %v1434_v27 = vadd.f32 %v3380_v11, %v1433_v7 }
 0x3e7   : > { %vm1436_vm13 = vweird.f32 %v3380_v11  ;;  %v1655_v22 = vmul.f32 %v3444_v60, %v3402_v18  ;;  %v1643_v39 = vmul.f32 %v3406_v61, %v1642_v17  ;;  %v1634_v2 = vsel %vm3450_vm12, %v3368_v14, %v1630_v31 }
 0x3e8   : > { %1749 = vxpose.xlu2.b32.cont [8/16] (narrow) %v1597_v30, 8  ;;  %v3456_v30 = vpop.eup %2221  ;;  %v1441_v43 = vand.u32 2147483648, %v3001_v55  ;;  %vm1435_vm14 = vweird.f32 %v3001_v55  ;;  %v1638_v53 = vor.u32 1.1754944e-38, %v1637_v19  ;;  %v1439_v24 = vand.u32 2147483647, %v3001_v55 }
 0x3e9   : > { %2225 = vrcp.f32 %v3032_v47  ;;  %vm1636_vm15 = vcmp.eq.f32.partialorder %v1635_v46, 8.507059e+37  ;;  %vm3468_vm0 = vmor %vm1435_vm14, %vm1436_vm13  ;;  %v1447_v38 = vmul.f32 %v3418_v29, %v1446_v37  ;;  %v1459_v52 = vmul.f32 %v3456_v30, %v3012_v3 }
 0x3ea   : > { %v1639_v14 = vsel %vm1636_vm15, %v1638_v53, %v1634_v2  ;;  %v1438_v50 = vsel %vm3468_vm0, %v3380_v11, %v1434_v27  ;;  %v1656_v41 = vsub.f32 1.0, %v1655_v22  ;;  %v1442_v55 = vor.u32 1.1754944e-38, %v1441_v43 }
 0x3eb   : > { %1719 = vxpose.xlu0.b32.cont [10/16] (narrow) %v1401_v35, 8  ;;  %v1644_v40 = vadd.f32 %v3406_v61, %v1643_v39  ;;  %vm1646_vm1 = vweird.f32 %v3406_v61  ;;  %vm1440_vm2 = vcmp.eq.f32.partialorder %v1439_v24, 8.507059e+37  ;;  %v1651_v28 = vand.u32 2147483648, %v3364_v56 }
 0x3ec   : > { %v3482_v0 = vpop.eup %2223  ;;  %vm1645_vm3 = vweird.f32 %v3364_v56  ;;  %v1443_v9 = vsel %vm1440_vm2, %v1442_v55, %v1438_v50  ;;  %v1649_v23 = vand.u32 2147483647, %v3364_v56  ;;  %v1460_v11 = vsub.f32 1.0, %v1459_v52 }
 0x3ed   : > { %v3478_v15 = vpop.xlane.xlu0 %1161  ;;  %vm3488_vm4 = vmor %vm1645_vm3, %vm1646_vm1  ;;  %v1448_v32 = vadd.f32 %v3418_v29, %v1447_v38  ;;  %vm1450_vm5 = vweird.f32 %v3418_v29  ;;  %v1669_v12 = vmul.f32 %v3482_v0, %v3440_v34  ;;  %v1455_v59 = vand.u32 2147483648, %v3016_v63 }
 0x3ee   : > { %2227 = vrcp.f32 %v3478_v15  ;;  %v1648_v56 = vsel %vm3488_vm4, %v3406_v61, %v1644_v40  ;;  %vm1449_vm6 = vweird.f32 %v3016_v63  ;;  %v1652_v25 = vor.u32 1.1754944e-38, %v1651_v28 }
 0x3ef   : > { %v3494_v21 = vpop.eup %2225  ;;  %v1453_v16 = vand.u32 2147483647, %v3016_v63  ;;  %vm1650_vm7 = vcmp.eq.f32.partialorder %v1649_v23, 8.507059e+37  ;;  %vm3505_vm8 = vmor %vm1449_vm6, %vm1450_vm5  ;;  %v1461_v10 = vmul.f32 %v3456_v30, %v1460_v11  ;;  %v1670_v26 = vsub.f32 1.0, %v1669_v12 }
 0x3f0   : > { %1750 = vxpose.xlu2.b32.cont [9/16] (narrow) %v1611_v13, 8  ;;  %v1657_v13 = vmul.f32 %v3444_v60, %v1656_v41  ;;  %v1653_v48 = vsel %vm1650_vm7, %v1652_v25, %v1648_v56  ;;  %v1452_v61 = vsel %vm3505_vm8, %v3418_v29, %v1448_v32  ;;  %v1456_v63 = vor.u32 1.1754944e-38, %v1455_v59  ;;  %v1187_v32 = vpop.f32.mrf.mxu0 }
 0x3f1   : > { %vm1660_vm9 = vweird.f32 %v3444_v60  ;;  %vm1454_vm10 = vcmp.eq.f32.partialorder %v1453_v16, 8.507059e+37  ;;  %v1665_v54 = vand.u32 2147483648, %v3402_v18  ;;  %vm1659_vm11 = vweird.f32 %v3402_v18 }
 0x3f2   : > { %v1658_v4 = vadd.f32 %v3444_v60, %v1657_v13  ;;  %v1457_v33 = vsel %vm1454_vm10, %v1456_v63, %v1452_v61  ;;  %v1663_v42 = vand.u32 2147483647, %v3402_v18  ;;  %vm1661_vm12 = vmor %vm1659_vm11, %vm1660_vm9  ;;  %v1462_v58 = vadd.f32 %v3456_v30, %v1461_v10 }
 0x3f3   : > { %1720 = vxpose.xlu0.b32.cont [11/16] (narrow) %v1415_v44, 8  ;;  %v1473_v44 = vmul.f32 %v3494_v21, %v3032_v47  ;;  %vm1464_vm13 = vweird.f32 %v3456_v30  ;;  %v1671_v1 = vmul.f32 %v3482_v0, %v1670_v26  ;;  %vm1463_vm14 = vweird.f32 %v3012_v3 }
 0x3f4   : > { %v3519_v5 = vpop.eup %2227  ;;  %v1662_v8 = vsel %vm1661_vm12, %v3444_v60, %v1658_v4  ;;  %v1666_v18 = vor.u32 1.1754944e-38, %v1665_v54  ;;  %v1467_v36 = vand.u32 2147483647, %v3012_v3  ;;  %vm1664_vm15 = vcmp.eq.f32.partialorder %v1663_v42, 8.507059e+37  ;;  %vm1465_vm0 = vmor %vm1463_vm14, %vm1464_vm13 }
 0x3f5   : > { %v3515_v45 = vpop.xlane.xlu2 %1164  ;;  %v1474_v29 = vsub.f32 1.0, %v1473_v44  ;;  %v1683_v7 = vmul.f32 %v3519_v5, %v3478_v15  ;;  %v1466_v31 = vsel %vm1465_vm0, %v3456_v30, %v1462_v58  ;;  %v1672_v46 = vadd.f32 %v3482_v0, %v1671_v1  ;;  %v3700_v1 = vld [vmem:[#allocation13_spill] sm:$0xff] }
 0x3f6   : > { %2229 = vrcp.f32 %v3515_v45  ;;  %v1667_v51 = vsel %vm1664_vm15, %v1666_v18, %v1662_v8  ;;  %vm1674_vm1 = vweird.f32 %v3482_v0  ;;  %vm1468_vm2 = vcmp.eq.f32.partialorder %v1467_v36, 8.507059e+37  ;;  %v3701_v8 = vld [vmem:[#allocation15_spill] sm:$0xff] }
 0x3f7   : > { %v1475_v17 = vmul.f32 %v3494_v21, %v1474_v29  ;;  %v1684_v19 = vsub.f32 1.0, %v1683_v7  ;;  %v1679_v37 = vand.u32 2147483648, %v3440_v34  ;;  %vm1673_vm3 = vweird.f32 %v3440_v34 }
 0x3f8   : > { %1751 = vxpose.xlu2.b32.cont [10/16] (narrow) %v1625_v62, 8  ;;  %v1469_v62 = vand.u32 2147483648, %v3012_v3  ;;  %v1677_v20 = vand.u32 2147483647, %v3440_v34  ;;  %vm1675_vm4 = vmor %vm1673_vm3, %vm1674_vm1  ;;  %vm1478_vm5 = vweird.f32 %v3494_v21  ;;  %v1483_v2 = vand.u32 2147483648, %v3032_v47  ;;  %v1190_v13 = vpop.f32.mrf.mxu0 }
 0x3f9   : > { %v1476_v27 = vadd.f32 %v3494_v21, %v1475_v17  ;;  %v1685_v30 = vmul.f32 %v3519_v5, %v1684_v19  ;;  %v1676_v39 = vsel %vm1675_vm4, %v3482_v0, %v1672_v46  ;;  %vm1477_vm6 = vweird.f32 %v3032_v47  ;;  %v3702_v17 = vld [vmem:[#allocation14_spill] sm:$0xff] }
 0x3fa   : > { %v1680_v43 = vor.u32 1.1754944e-38, %v1679_v37  ;;  %v1481_v53 = vand.u32 2147483647, %v3032_v47  ;;  %vm1678_vm7 = vcmp.eq.f32.partialorder %v1677_v20, 8.507059e+37  ;;  %vm1479_vm8 = vmor %vm1477_vm6, %vm1478_vm5  ;;  %v1484_v38 = vor.u32 1.1754944e-38, %v1483_v2 }
 0x3fb   : > { %1721 = vxpose.xlu0.b32.cont [12/16] (narrow) %v1429_v6, 8  ;;  %v1470_v6 = vor.u32 1.1754944e-38, %v1469_v62  ;;  %v1480_v24 = vsel %vm1479_vm8, %v3494_v21, %v1476_v27  ;;  %v1686_v52 = vadd.f32 %v3519_v5, %v1685_v30  ;;  %vm1688_vm9 = vweird.f32 %v3519_v5  ;;  %v1210_v21 = vpop.f32.mrf.mxu1 }
 0x3fc   : > { %v2230_v60 = vpop.eup %2229  ;;  %v1681_v34 = vsel %vm1678_vm7, %v1680_v43, %v1676_v39  ;;  %vm1482_vm10 = vcmp.eq.f32.partialorder %v1481_v53, 8.507059e+37  ;;  %vm1687_vm11 = vweird.f32 %v3478_v15  ;;  %v1691_v47 = vand.u32 2147483647, %v3478_v15 }
 0x3fd   : > { %v1471_v3 = vsel %vm1468_vm2, %v1470_v6, %v1466_v31  ;;  %v1697_v22 = vmul.f32 %v2230_v60, %v3515_v45  ;;  %v1485_v50 = vsel %vm1482_vm10, %v1484_v38, %v1480_v24  ;;  %vm1689_vm12 = vmor %vm1687_vm11, %vm1688_vm9  ;;  %vm1702_vm14 = vweird.f32 %v2230_v60  ;;  %v3703_v31 = vld [vmem:[#allocation16_spill] sm:$0xff] }
 0x3fe   : > { %v1690_v55 = vsel %vm1689_vm12, %v3519_v5, %v1686_v52  ;;  %vm1692_vm13 = vcmp.eq.f32.partialorder %v1691_v47, 8.507059e+37  ;;  %vm1701_vm15 = vweird.f32 %v3515_v45  ;;  %v1705_v23 = vand.u32 2147483647, %v3515_v45 }
 0x3ff   : > { %v1698_v35 = vsub.f32 1.0, %v1697_v22  ;;  %vm1703_vm0 = vmor %vm1701_vm15, %vm1702_vm14  ;;  %v1211_v44 = vadd.f32 %v1210_v21, %v1187_v32  ;;  %v1781_v26 = vstv %s1780_s13 }
 0x400   : > { %1752 = vxpose.xlu2.b32.cont [11/16] (narrow) %v1639_v14, 8  ;;  %v1693_v14 = vand.u32 2147483648, %v3478_v15  ;;  %vm1706_vm1 = vcmp.eq.f32.partialorder %v1705_v23, 8.507059e+37 }
 0x401   : > { %v1699_v41 = vmul.f32 %v2230_v60, %v1698_v35 }
 0x402   : > { %v1694_v40 = vor.u32 1.1754944e-38, %v1693_v14 }
 0x403   : > { %1722 = vxpose.xlu0.b32.cont [13/16] (narrow) %v1443_v9, 8  ;;  %v1700_v28 = vadd.f32 %v2230_v60, %v1699_v41  ;;  %v1707_v9 = vand.u32 2147483648, %v3515_v45  ;;  %v1213_v12 = vpop.f32.mrf.mxu1 }
 0x404   : > { %v1695_v0 = vsel %vm1692_vm13, %v1694_v40, %v1690_v55  ;;  %v1214_v10 = vadd.f32 %v1213_v12, %v1190_v13 }
 0x405   : > { %v1704_v11 = vsel %vm1703_vm0, %v2230_v60, %v1700_v28  ;;  %v1708_v15 = vor.u32 1.1754944e-38, %v1707_v9 }
 0x407   : > { %v1709_v57 = vsel %vm1706_vm1, %v1708_v15, %v1704_v11 }
 0x408   : > { %1753 = vxpose.xlu2.b32.cont [12/16] (narrow) %v1653_v48, 8 }
 0x40b   : > { %1723 = vxpose.xlu0.b32.cont [14/16] (narrow) %v1457_v33, 8 }
 0x410   : > { %1754 = vxpose.xlu2.b32.cont [13/16] (narrow) %v1667_v51, 8 }
 0x413   : > { %1724 = vxpose.xlu0.b32.cont [15/16] (narrow) %v1471_v3, 8 }
 0x418   : > { %1755 = vxpose.xlu2.b32.cont [14/16] (narrow) %v1681_v34, 8 }
 0x41b   : > { %1725 = vxpose.xlu0.b32.end [16/16] (narrow) %v1485_v50, 8 }
 0x420   : > { %1756 = vxpose.xlu2.b32.cont [15/16] (narrow) %v1695_v0, 8 }
 0x428   : > { %1757 = vxpose.xlu2.b32.end [16/16] (narrow) %v1709_v57, 8 }
 0x43c   : > { %v1233_v56 = vpop.f32.mrf.mxu0  ;;  %v1256_v59 = vpop.f32.mrf.mxu1 }
 0x43d   : > { %v1257_v61 = vadd.f32 %v1256_v59, %v1233_v56 }
 0x444   : > { %v1236_v25 = vpop.f32.mrf.mxu0  ;;  %v1259_v16 = vpop.f32.mrf.mxu1 }
 0x445   : > { %v1260_v63 = vadd.f32 %v1259_v16, %v1236_v25 }
 0x447   : > { %v1726_v49 = vpop.trf.xlu0 }
 0x448   : > { %v1774_v48 = vperm.slane %v1726_v49, 0 }
 0x449   : > { %v1758_v45 = vpop.trf.xlu2 }
 0x44a   : > { %v1776_v4 = vmul.f32 %v1774_v48, %v1211_v44  ;;  %v1778_v5 = vmul.f32 %v1774_v48, %v1214_v10  ;;  %v1775_v54 = vperm.slane %v1758_v45, 0 }
 0x44c   : > { %v1782_v33 = vmul.f32 %v1781_v26, %v1776_v4  ;;  %v1784_v42 = vmul.f32 %v1781_v26, %v1778_v5  ;;  %v1777_v29 = vmul.f32 %v1775_v54, %v1257_v61  ;;  %v1779_v58 = vmul.f32 %v1775_v54, %v1260_v63 }
 0x44e   : > { %v1786_v7 = vadd.f32 %v1782_v33, %v3700_v1  ;;  %v1788_v62 = vadd.f32 %v1784_v42, %v3701_v8  ;;  %v1783_v18 = vmul.f32 %v1781_v26, %v1777_v29  ;;  %v1785_v36 = vmul.f32 %v1781_v26, %v1779_v58 }
 0x450   : > { %1790 = vst [vmem:[%s2416_s10] sm:$0xff] %v1786_v7  ;;  %v1787_v51 = vadd.f32 %v1783_v18, %v3702_v17  ;;  %v1789_v19 = vadd.f32 %v1785_v36, %v3703_v31 }
 0x451   : > { %1792 = vst [vmem:[%s2416_s10 + $0x10] sm:$0xff] %v1788_v62 }
 0x452   : > { %1791 = vst [vmem:[%s2416_s10 + $0x8] sm:$0xff] %v1787_v51 }
 0x453   : > { %1793 = vst [vmem:[%s2416_s10 + $0x18] sm:$0xff] %v1789_v19 }
 0x454   : > { %2258 = shalt.err (!%p2255_p3)
}
 0x455   : > { %s2314_s30 = smov 256   ;;  %s2315_s10 = smov 16  }
 0x456   : > { %1978 = dma.vmem_to_hbm [thread:$0]  (%p2384_p4), %s1810_s3, 512, %s1812_s23, %s1795_s20, %s2314_s30, %s2314_s30, %s2315_s10  }
 0x457 PF: > { %p1984_p5 = scmp.ge.s32.totalorder %s2311_s22, 2  ;;  %s1826_s11 = sand.u32 1, %s2291_s17  }
 0x458   : > { %s1827_s12 = scalar_lea.sflag [#allocation9], %s1826_s11 }
 0x459   : > { %p1981_p6 = pnand %p1984_p5, %p2391_p8 }
 0x45b   : > { %p1982_p7 = pneg %p1981_p6 }
 0x45d   : > { %2286 = dma.done.wait (%p1982_p7), %s1827_s12, 512  }
 0x45e   : > { %2288 = vsyncadd (%p1982_p7), %s1827_s12, 4294966784  ;;  %s18_s22 = sadd.s32 1, %s2311_s22   ;;  %s3704_s17 = smov %s2295_s18 }
 0x45f   : > { %p15_p9 = scmp.ge.s32.totalorder %s18_s22, 4   ;;  %s3705_s18 = smov %s2299_s19 }
 0x460   : > { %s3706_s19 = smov %s2397_s29  ;;  %s3707_s20 = smov %s2307_s21 }
 0x461   : > { %s3708_s21 = smov %s3710_s24  ;;  %17 = sbr.rel (!%p15_p9) target bundleno = 6 (0x6), region = 94 }
 0x466   :  { %1833 = vsyncpa [#allocation9], 1 }
 0x467   :  { %1835 = vsyncpa [#allocation9 + $0x1], 1 }
 0x468   :  { %1836 = vsyncmov [#allocation6] }
 0x46b   :  { %s1837_s26 = vpop.sfrf %1836 }
 0x46c   :  { %p1973_p4 = scmp.ne.s32.totalorder %s1837_s26, 0 }
 0x46e   :  { %1841 = shalt.err (%p1973_p4)  }

</bundles_post_ra>
